<compile_context>
chip_gen: v6e
topology: v6e:2x2x1
jax: 0.10.0
libtpu: 0.0.40
codegen_flags: <defaults>
</compile_context>

<pallas_src>
import math
import functools

import jax
import jax.numpy as jnp
import numpy as np
from jax.experimental import pallas as pl
from jax.experimental.pallas import tpu as pltpu


# ----------------------------- in-kernel helpers -----------------------------

def _layernorm(z, eps=1e-6):
    mu = jnp.mean(z, axis=-1, keepdims=True)
    var = jnp.mean((z - mu) ** 2, axis=-1, keepdims=True)
    return (z - mu) * jax.lax.rsqrt(var + eps)


def _gelu_tanh(z):
    c = math.sqrt(2.0 / math.pi)
    return 0.5 * z * (1.0 + jnp.tanh(c * (z + 0.044715 * z * z * z)))


def _pick_tile(total, target, mult):
    """Largest divisor of `total` that is <= target and a multiple of `mult`, else `total`."""
    if total <= target:
        return total
    start = target - (target % mult)
    for cand in range(start, mult - 1, -mult):
        if cand > 0 and total % cand == 0:
            return cand
    return total


def _tpu_defaults():
    """Generation-aware (vmem_limit_bytes, q_tile, kv_tile, mlp_tile)."""
    vmem_cap = None
    chip = ""
    try:
        info = pltpu.get_tpu_info()
        vmem_cap = getattr(info, "vmem_capacity_bytes", None)
        chip = str(getattr(info, "chip_version", "") or "")
    except Exception:
        pass
    if vmem_cap is None:
        vmem_cap = 64 * 1024 * 1024                  # conservative (v7x-class) default
    if vmem_cap <= 96 * 1024 * 1024:                 # v7x: 64 MiB physical VMEM per TC
        return 56 * 1024 * 1024, 256, 256, 512
    if "5" in chip:                                  # v5e: 0.8 TB/s HBM, no bf16 VPU/EUP
        return 100 * 1024 * 1024, 128, 256, 512
    return 100 * 1024 * 1024, 512, 256, 512          # v6e-class: 128 MiB VMEM


def _resident_spec(p):
    """Full-array, grid-invariant weight block; single-buffered (never re-fetched)."""
    nd = p.ndim
    return pl.BlockSpec(p.shape, lambda *_, nd=nd: (0,) * nd,
                        pipeline_mode=pl.Buffered(1))


# --------------------------- kernel 1: adaLN + fused QKV ----------------------

def preattn_qkv_kernel(sm_scale, x_ref, mods_ref, w_qkv_ref, b_qkv_ref, qkln_ref,
                       q_ref, k_ref, v_ref):
    """adaLN(x, t) -> fused QKV projection -> affine QK layernorms.

    q/k/v are written as lane-dense (T_tile, C) bf16 slabs (no per-head masked stores);
    1/sqrt(D) is folded into q.
    """
    x = x_ref[0].astype(jnp.float32)            # (TT, C)
    C = x.shape[-1]

    mods = mods_ref[0].astype(jnp.float32)      # (6, C); rows 0,1 = shift1, scale1
    xm = _layernorm(x) * (1.0 + mods[1:2]) + mods[0:1]

    qkv = jnp.dot(xm.astype(jnp.bfloat16), w_qkv_ref[...],
                  preferred_element_type=jnp.float32) + b_qkv_ref[...]   # (TT, 3C) f32
    q = qkv[:, 0 * C:1 * C]
    k = qkv[:, 1 * C:2 * C]
    v = qkv[:, 2 * C:3 * C]

    qkln = qkln_ref[...].astype(jnp.float32)    # (4, C) = [q_gamma, q_beta, k_gamma, k_beta]
    q = (_layernorm(q) * qkln[0:1] + qkln[1:2]) * sm_scale
    k = _layernorm(k) * qkln[2:3] + qkln[3:4]

    q_ref[0] = q.astype(q_ref.dtype)            # lane-dense (TT, C) stores
    k_ref[0] = k.astype(k_ref.dtype)
    v_ref[0] = v.astype(v_ref.dtype)


# --------------------------- kernel 2: flash attention ------------------------

def flash_attn_kernel(q_ref, k_ref, v_ref, o_ref, m_sc, l_sc, acc_sc):
    """Online-softmax attention over KV tiles. K arrives pre-transposed as (H, D, TK)."""
    kv = pl.program_id(2)

    @pl.when(kv == 0)
    def _init():
        m_sc[...] = jnp.full(m_sc.shape, -jnp.inf, m_sc.dtype)
        l_sc[...] = jnp.zeros(l_sc.shape, l_sc.dtype)
        acc_sc[...] = jnp.zeros(acc_sc.shape, acc_sc.dtype)

    qh = q_ref[0]                                # (H, TQ, D) bf16, pre-scaled by 1/sqrt(D)
    kt = k_ref[0]                                # (H, D, TK) bf16  == K^T
    vh = v_ref[0]                                # (H, TK, D) bf16

    s = jnp.einsum("hqd,hdk->hqk", qh, kt,
                   preferred_element_type=jnp.float32)        # (H, TQ, TK) f32
    m_prev = m_sc[...]
    m_new = jnp.maximum(m_prev, jnp.max(s, axis=-1, keepdims=True))
    alpha = jnp.exp(m_prev - m_new)
    # TODO(synk): on v6e/v7x compute this exp in bf16 (keep m/l/alpha in f32) once
    # re-validated against the f32 reference; v5e has no bf16 EUP, keep f32 there.
    p = jnp.exp(s - m_new)
    l_sc[...] = alpha * l_sc[...] + jnp.sum(p, axis=-1, keepdims=True)
    acc_sc[...] = alpha * acc_sc[...] + jnp.einsum(
        "hqk,hkd->hqd", p.astype(jnp.bfloat16), vh,
        preferred_element_type=jnp.float32)
    m_sc[...] = m_new

    @pl.when(kv == pl.num_programs(2) - 1)
    def _finalize():
        o_ref[0] = (acc_sc[...] * pl.reciprocal(l_sc[...], approx=True)).astype(o_ref.dtype)


# --------------- kernel 3: linear_v + adaLN + MLP (expansion-dim streamed) ----

def postattn_mlp_kernel(attn_ref, x_ref, mods_ref,
                        w_linv_ref, b_linv_ref,
                        w_mlp1_ref, b_mlp1_ref, w_mlp2_ref, b_mlp2_ref,
                        o_ref, yn_sc, acc_sc):
    """Post-attention block.  Grid axis 2 streams the 4C expansion dimension so the
    MLP weights are never fully resident in VMEM and the (TQ, 4C) GELU intermediate
    never materializes (only one (TQ, TE) slab per step)."""
    e = pl.program_id(2)

    @pl.when(e == 0)
    def _first():
        x = x_ref[0].astype(jnp.float32)             # (TQ, C)
        mods = mods_ref[0].astype(jnp.float32)       # (6, C)
        # linear_v as ONE (TQ, C) @ (C, C) matmul (attention output arrives lane-dense).
        y = jnp.dot(attn_ref[0], w_linv_ref[...],
                    preferred_element_type=jnp.float32) + b_linv_ref[...]
        y = x + y * mods[2:3]                        # residual 1 (f32), mods_v
        yn = _layernorm(y) * (1.0 + mods[4:5]) + mods[3:4]   # adaLN-2 (scale2, shift2)
        yn_sc[...] = yn.astype(yn_sc.dtype)
        acc_sc[...] = jnp.zeros(acc_sc.shape, acc_sc.dtype)

    h1 = jnp.dot(yn_sc[...], w_mlp1_ref[...],
                 preferred_element_type=jnp.float32) + b_mlp1_ref[...]   # (TQ, TE) f32
    h1 = _gelu_tanh(h1)    # f32; TODO(synk): bf16 GELU on v6e/v7x after validation
    acc_sc[...] += jnp.dot(h1.astype(jnp.bfloat16), w_mlp2_ref[...],
                           preferred_element_type=jnp.float32)

    @pl.when(e == pl.num_programs(2) - 1)
    def _last():
        x = x_ref[0].astype(jnp.float32)
        mods = mods_ref[0].astype(jnp.float32)
        y2 = acc_sc[...] + b_mlp2_ref[...]
        o_ref[0] = (x + y2 * mods[5:6]).astype(o_ref.dtype)   # residual 2 from ORIGINAL x


# --------------------------------- wrapper ------------------------------------

def dit_block_forward(x, t, params, num_heads, *, q_tile=None, kv_tile=None, mlp_tile=None):
    """DiTBlock forward (mask=None path)."""
    B, T, C = x.shape
    H = num_heads
    assert C % H == 0
    D = C // H
    E = params["w_mlp1"].shape[1]

    vmem_limit, q_t, kv_t, mlp_t = _tpu_defaults()
    q_tile = q_t if q_tile is None else q_tile
    kv_tile = kv_t if kv_tile is None else kv_tile
    mlp_tile = mlp_t if mlp_tile is None else mlp_tile

    # ---- conditioning path (M=1 matmuls) stays in plain JAX, fused to one (C,6C) ----
    st = (t * jax.nn.sigmoid(t)).astype(jnp.float32)                   # SiLU(t), (B,1,C)
    mods = (st[:, 0, :] @ params["w_mod"] + params["b_mod"]).reshape(B, 6, C)
    mods = mods.astype(jnp.float32)

    sm_scale = 1.0 / math.sqrt(D)
    TQ = _pick_tile(T, q_tile, 8)      # q / row tile (sublane dim)
    TK = _pick_tile(T, kv_tile, 128)   # kv tile (lane dim of the pre-transposed K)
    TE = _pick_tile(E, mlp_tile, 128)  # MLP expansion tile (lane dim of w_mlp1 blocks)
    nt_q, nt_kv, n_exp = T // TQ, T // TK, E // TE

    cp = functools.partial(pltpu.CompilerParams, vmem_limit_bytes=vmem_limit)

    # ---------------- kernel 1: adaLN + fused QKV + QK layernorm -------------------
    q_flat, k_flat, v_flat = pl.pallas_call(
        functools.partial(preattn_qkv_kernel, sm_scale),
        out_shape=tuple(jax.ShapeDtypeStruct((B, T, C), jnp.bfloat16) for _ in range(3)),
        grid_spec=pltpu.PrefetchScalarGridSpec(
            num_scalar_prefetch=0,
            grid=(B, nt_q),
            in_specs=[
                pl.BlockSpec((1, TQ, C), lambda b, i: (b, i, 0)),      # x tile
                pl.BlockSpec((1, 6, C), lambda b, i: (b, 0, 0)),       # conditioning vectors
                _resident_spec(params["w_qkv"]),
                _resident_spec(params["b_qkv"]),
                _resident_spec(params["qkln"]),
            ],
            out_specs=[pl.BlockSpec((1, TQ, C), lambda b, i: (b, i, 0))
                       for _ in range(3)],
        ),
        compiler_params=cp(dimension_semantics=("parallel", "parallel")),
    )(x, mods, params["w_qkv"], params["b_qkv"], params["qkln"])

    # Head split / K pre-transpose as a fused XLA relayout copy between kernels so the
    # Pallas stores stay lane-dense and kernel 2 gets a directly-consumable (D, TK) RHS.
    # TODO(synk): fold into kernel 1 with pltpu.einshape at production shapes.
    qh = q_flat.reshape(B, T, H, D).transpose(0, 2, 1, 3)   # (B, H, T, D)
    kt = k_flat.reshape(B, T, H, D).transpose(0, 2, 3, 1)   # (B, H, D, T)  == K^T
    vh = v_flat.reshape(B, T, H, D).transpose(0, 2, 1, 3)   # (B, H, T, D)

    # ---------------------- kernel 2: flash self-attention -------------------------
    attn_hm = pl.pallas_call(
        flash_attn_kernel,
        out_shape=jax.ShapeDtypeStruct((B, H, T, D), jnp.bfloat16),
        grid_spec=pltpu.PrefetchScalarGridSpec(
            num_scalar_prefetch=0,
            grid=(B, nt_q, nt_kv),
            in_specs=[
                pl.BlockSpec((1, H, TQ, D), lambda b, qi, kv: (b, 0, qi, 0)),  # q
                # K^T / V are re-streamed once per q tile; large TQ bounds that traffic.
                # TODO(synk): sweep pipeline_mode=pl.Buffered(3) here on v6e/v5e.
                pl.BlockSpec((1, H, D, TK), lambda b, qi, kv: (b, 0, 0, kv)),  # K^T
                pl.BlockSpec((1, H, TK, D), lambda b, qi, kv: (b, 0, kv, 0)),  # v
            ],
            out_specs=pl.BlockSpec((1, H, TQ, D), lambda b, qi, kv: (b, 0, qi, 0)),
            scratch_shapes=[
                pltpu.VMEM((H, TQ, 1), jnp.float32),   # running max
                pltpu.VMEM((H, TQ, 1), jnp.float32),   # running denominator
                pltpu.VMEM((H, TQ, D), jnp.float32),   # output accumulator
            ],
        ),
        compiler_params=cp(dimension_semantics=("parallel", "parallel", "arbitrary")),
    )(qh, kt, vh)

    # Back to lane-dense (B, T, C) for a single-matmul linear_v (XLA fused relayout).
    attn = attn_hm.transpose(0, 2, 1, 3).reshape(B, T, C)

    # ------- kernel 3: linear_v + residual + adaLN + MLP (expansion streamed) ------
    out = pl.pallas_call(
        postattn_mlp_kernel,
        out_shape=jax.ShapeDtypeStruct((B, T, C), x.dtype),
        grid_spec=pltpu.PrefetchScalarGridSpec(
            num_scalar_prefetch=0,
            grid=(B, nt_q, n_exp),
            in_specs=[
                pl.BlockSpec((1, TQ, C), lambda b, i, e: (b, i, 0)),   # attention output
                pl.BlockSpec((1, TQ, C), lambda b, i, e: (b, i, 0)),   # original x (residuals)
                pl.BlockSpec((1, 6, C), lambda b, i, e: (b, 0, 0)),    # conditioning
                _resident_spec(params["w_linv"]),
                _resident_spec(params["b_linv"]),
                # MLP weights streamed per expansion tile -> never fully VMEM-resident.
                pl.BlockSpec((C, TE), lambda b, i, e: (0, e)),         # w_mlp1 column slab
                pl.BlockSpec((1, TE), lambda b, i, e: (0, e)),         # b_mlp1 slab
                pl.BlockSpec((TE, C), lambda b, i, e: (e, 0)),         # w_mlp2 row slab
                _resident_spec(params["b_mlp2"]),
            ],
            out_specs=pl.BlockSpec((1, TQ, C), lambda b, i, e: (b, i, 0)),
            scratch_shapes=[
                pltpu.VMEM((TQ, C), jnp.bfloat16),   # modulated LN(y), held across exp tiles
                pltpu.VMEM((TQ, C), jnp.float32),    # y2 accumulator
            ],
        ),
        compiler_params=cp(dimension_semantics=("parallel", "parallel", "arbitrary")),
    )(attn, x, mods, params["w_linv"], params["b_linv"],
      params["w_mlp1"], params["b_mlp1"], params["w_mlp2"], params["b_mlp2"])
    return out


# --------------------------- pure-JAX reference --------------------------------

def dit_block_ref(x, t, p, num_heads):
    B, T, C = x.shape
    H = num_heads
    D = C // H
    f32, bf16 = jnp.float32, jnp.bfloat16

    def ln(z, eps=1e-6):
        mu = jnp.mean(z, axis=-1, keepdims=True)
        var = jnp.mean((z - mu) ** 2, axis=-1, keepdims=True)
        return (z - mu) * jax.lax.rsqrt(var + eps)

    st = t * jax.nn.sigmoid(t)
    mods = (st[:, 0, :] @ p["w_mod"] + p["b_mod"]).reshape(B, 6, C)
    shift1, scale1, mods_v, shift2, scale2, mods_o = [mods[:, i:i + 1, :] for i in range(6)]

    xm = ln(x) * (1.0 + scale1) + shift1
    qkv = jnp.dot(xm.astype(bf16), p["w_qkv"], preferred_element_type=f32) + p["b_qkv"]
    q, k, v = qkv[..., :C], qkv[..., C:2 * C], qkv[..., 2 * C:]
    qg, qb, kg, kb = p["qkln"][0], p["qkln"][1], p["qkln"][2], p["qkln"][3]
    q = ((ln(q) * qg + qb) * (1.0 / math.sqrt(D))).astype(bf16)
    k = (ln(k) * kg + kb).astype(bf16)
    v = v.astype(bf16)

    qh = q.reshape(B, T, H, D).transpose(0, 2, 1, 3)
    kh = k.reshape(B, T, H, D).transpose(0, 2, 1, 3)
    vh = v.reshape(B, T, H, D).transpose(0, 2, 1, 3)
    s = jnp.einsum("bhtd,bhsd->bhts", qh, kh, preferred_element_type=f32)
    pr = jax.nn.softmax(s, axis=-1)
    attn = jnp.einsum("bhts,bhsd->bhtd", pr.astype(bf16), vh, preferred_element_type=f32)
    attn = attn.transpose(0, 2, 1, 3).reshape(B, T, C)

    y = jnp.dot(attn.astype(bf16), p["w_linv"], preferred_element_type=f32) + p["b_linv"]
    y = x + y * mods_v
    yn = ln(y) * (1.0 + scale2) + shift2
    h1 = jnp.dot(yn.astype(bf16), p["w_mlp1"], preferred_element_type=f32) + p["b_mlp1"]
    h1 = 0.5 * h1 * (1.0 + jnp.tanh(math.sqrt(2.0 / math.pi) * (h1 + 0.044715 * h1 ** 3)))
    y2 = jnp.dot(h1.astype(bf16), p["w_mlp2"], preferred_element_type=f32) + p["b_mlp2"]
    return x + y2 * mods_o


# --------------------------------- params --------------------------------------

def make_params(key, C, expansion_factor):
    E = expansion_factor * C
    ks = list(jax.random.split(key, 16))
    it = iter(ks)

    def w(shape, std=0.02, dtype=jnp.float32):
        return (std * jax.random.normal(next(it), shape)).astype(dtype)

    bf16 = jnp.bfloat16
    # NOTE: the torch module zero-inits the adaLN/modulation projections; small random
    # values are used here so the kernel path is actually exercised (math is identical).
    return {
        # fused conditioning projection: columns = [shift1|scale1|mods_v|shift2|scale2|mods_o]
        "w_mod": w((C, 6 * C)), "b_mod": w((1, 6 * C)),
        # fused QKV projection stored (in, out): y = x @ W + b
        "w_qkv": w((C, 3 * C), dtype=bf16), "b_qkv": w((1, 3 * C)),
        # affine QK layernorm params, rows = [q_gamma, q_beta, k_gamma, k_beta]
        "qkln": jnp.concatenate(
            [1.0 + w((1, C)), w((1, C)), 1.0 + w((1, C)), w((1, C))], axis=0),
        "w_linv": w((C, C), dtype=bf16), "b_linv": w((1, C)),
        "w_mlp1": w((C, E), dtype=bf16), "b_mlp1": w((1, E)),
        "w_mlp2": w((E, C), dtype=bf16), "b_mlp2": w((1, C)),
    }


# ------------------------------------ main --------------------------------------

if __name__ == "__main__":
    B, T, C, H, EXP = 2, 256, 64, 4, 4

    key = jax.random.PRNGKey(0)
    kx, kt, kp = jax.random.split(key, 3)
    x = jax.random.normal(kx, (B, T, C), dtype=jnp.float32)
    t = jax.random.normal(kt, (B, 1, C), dtype=jnp.float32)
    params = make_params(kp, C, EXP)

    # Explicit small tiles so the flash kv accumulation (2x2 q/kv tiles) and the MLP
    # expansion streaming (2 tiles of E=256) are exercised even at this demo size.
    out = jax.block_until_ready(
        dit_block_forward(x, t, params, H, q_tile=128, kv_tile=128, mlp_tile=128))

    ref = jax.block_until_ready(dit_block_ref(x, t, params, H))
    np.testing.assert_allclose(np.asarray(out), np.asarray(ref), rtol=2e-2, atol=2e-2)

    print("KERNEL_OK")
</pallas_src>

<mosaic_0001>
module attributes {stable_mosaic.version = 11 : i64} {
  func.func @preattn_qkv_kernel(%arg0: i32, %arg1: i32, %arg2: memref<1x128x64xf32, #tpu.memory_space<vmem>>, %arg3: memref<1x6x64xf32, #tpu.memory_space<vmem>>, %arg4: memref<64x192xbf16, #tpu.memory_space<vmem>>, %arg5: memref<1x192xf32, #tpu.memory_space<vmem>>, %arg6: memref<4x64xf32, #tpu.memory_space<vmem>>, %arg7: memref<1x128x64xbf16, #tpu.memory_space<vmem>>, %arg8: memref<1x128x64xbf16, #tpu.memory_space<vmem>>, %arg9: memref<1x128x64xbf16, #tpu.memory_space<vmem>>) attributes {dimension_semantics = [#tpu.dimension_semantics<parallel>, #tpu.dimension_semantics<parallel>], iteration_bounds = array<i64: 2, 2>, scalar_prefetch = 0 : i64, scratch_operands = 0 : i64, tpu.core_type = #tpu.core_type<tc>, window_params = [{transform_indices = @transform_0, window_bounds = array<i64: 1, 128, 64>}, {transform_indices = @transform_1, window_bounds = array<i64: 1, 6, 64>}, {pipeline_mode = #tpu.pipeline_mode<synchronous>, transform_indices = @transform_2, window_bounds = array<i64: 64, 192>}, {pipeline_mode = #tpu.pipeline_mode<synchronous>, transform_indices = @transform_3, window_bounds = array<i64: 1, 192>}, {pipeline_mode = #tpu.pipeline_mode<synchronous>, transform_indices = @transform_4, window_bounds = array<i64: 4, 64>}, {transform_indices = @transform_5, window_bounds = array<i64: 1, 128, 64>}, {transform_indices = @transform_6, window_bounds = array<i64: 1, 128, 64>}, {transform_indices = @transform_7, window_bounds = array<i64: 1, 128, 64>}]} {
    %c0 = arith.constant 0 : index
    %c0_0 = arith.constant 0 : index
    %c0_1 = arith.constant 0 : index
    %0 = vector.load %arg2[%c0, %c0_0, %c0_1] : memref<1x128x64xf32, #tpu.memory_space<vmem>>, vector<1x128x64xf32>
    %1 = vector.shape_cast %0 : vector<1x128x64xf32> to vector<128x64xf32>
    %c0_2 = arith.constant 0 : index
    %c0_3 = arith.constant 0 : index
    %c0_4 = arith.constant 0 : index
    %2 = vector.load %arg3[%c0_2, %c0_3, %c0_4] : memref<1x6x64xf32, #tpu.memory_space<vmem>>, vector<1x6x64xf32>
    %3 = vector.shape_cast %2 : vector<1x6x64xf32> to vector<6x64xf32>
    %cst = arith.constant dense<0.000000e+00> : vector<128xf32>
    %4 = vector.multi_reduction <add>, %1, %cst [1] : vector<128x64xf32> to vector<128xf32>
    %5 = vector.shape_cast %4 : vector<128xf32> to vector<128x1xf32>
    %cst_5 = arith.constant 6.400000e+01 : f32
    %6 = vector.broadcast %cst_5 : f32 to vector<128x1xf32>
    %7 = arith.divf %5, %6 : vector<128x1xf32>
    %8 = vector.broadcast %7 : vector<128x1xf32> to vector<128x64xf32>
    %9 = arith.subf %1, %8 : vector<128x64xf32>
    %10 = arith.mulf %9, %9 : vector<128x64xf32>
    %cst_6 = arith.constant dense<0.000000e+00> : vector<128xf32>
    %11 = vector.multi_reduction <add>, %10, %cst_6 [1] : vector<128x64xf32> to vector<128xf32>
    %12 = vector.shape_cast %11 : vector<128xf32> to vector<128x1xf32>
    %cst_7 = arith.constant 6.400000e+01 : f32
    %13 = vector.broadcast %cst_7 : f32 to vector<128x1xf32>
    %14 = arith.divf %12, %13 : vector<128x1xf32>
    %15 = vector.broadcast %7 : vector<128x1xf32> to vector<128x64xf32>
    %16 = arith.subf %1, %15 : vector<128x64xf32>
    %cst_8 = arith.constant 9.99999997E-7 : f32
    %17 = vector.broadcast %cst_8 : f32 to vector<128x1xf32>
    %18 = arith.addf %14, %17 : vector<128x1xf32>
    %19 = math.rsqrt %18 : vector<128x1xf32>
    %20 = vector.broadcast %19 : vector<128x1xf32> to vector<128x64xf32>
    %21 = arith.mulf %16, %20 : vector<128x64xf32>
    %22 = vector.extract_strided_slice %3 {offsets = [1, 0], sizes = [1, 64], strides = [1, 1]} : vector<6x64xf32> to vector<1x64xf32>
    %cst_9 = arith.constant 1.000000e+00 : f32
    %23 = vector.broadcast %cst_9 : f32 to vector<1x64xf32>
    %24 = arith.addf %23, %22 : vector<1x64xf32>
    %25 = vector.broadcast %24 : vector<1x64xf32> to vector<128x64xf32>
    %26 = arith.mulf %21, %25 : vector<128x64xf32>
    %27 = vector.extract_strided_slice %3 {offsets = [0, 0], sizes = [1, 64], strides = [1, 1]} : vector<6x64xf32> to vector<1x64xf32>
    %28 = vector.broadcast %27 : vector<1x64xf32> to vector<128x64xf32>
    %29 = arith.addf %26, %28 : vector<128x64xf32>
    %30 = arith.truncf %29 : vector<128x64xf32> to vector<128x64xbf16>
    %c0_10 = arith.constant 0 : index
    %c0_11 = arith.constant 0 : index
    %31 = vector.load %arg4[%c0_10, %c0_11] : memref<64x192xbf16, #tpu.memory_space<vmem>>, vector<64x192xbf16>
    %cst_12 = arith.constant dense<0.000000e+00> : vector<128x192xf32>
    %32 = tpu.matmul %30, %31, %cst_12 {dimension_numbers = #tpu.dot_dimension_numbers<[1], [0], [0], [1], [0, 0, 1, 1], [], []>} : vector<128x64xbf16>, vector<64x192xbf16>, vector<128x192xf32> -> vector<128x192xf32>
    %c0_13 = arith.constant 0 : index
    %c0_14 = arith.constant 0 : index
    %33 = vector.load %arg5[%c0_13, %c0_14] : memref<1x192xf32, #tpu.memory_space<vmem>>, vector<1x192xf32>
    %34 = vector.broadcast %33 : vector<1x192xf32> to vector<128x192xf32>
    %35 = arith.addf %32, %34 : vector<128x192xf32>
    %36 = vector.extract_strided_slice %35 {offsets = [0, 0], sizes = [128, 64], strides = [1, 1]} : vector<128x192xf32> to vector<128x64xf32>
    %37 = vector.extract_strided_slice %35 {offsets = [0, 64], sizes = [128, 64], strides = [1, 1]} : vector<128x192xf32> to vector<128x64xf32>
    %38 = vector.extract_strided_slice %35 {offsets = [0, 128], sizes = [128, 64], strides = [1, 1]} : vector<128x192xf32> to vector<128x64xf32>
    %c0_15 = arith.constant 0 : index
    %c0_16 = arith.constant 0 : index
    %39 = vector.load %arg6[%c0_15, %c0_16] : memref<4x64xf32, #tpu.memory_space<vmem>>, vector<4x64xf32>
    %cst_17 = arith.constant dense<0.000000e+00> : vector<128xf32>
    %40 = vector.multi_reduction <add>, %36, %cst_17 [1] : vector<128x64xf32> to vector<128xf32>
    %41 = vector.shape_cast %40 : vector<128xf32> to vector<128x1xf32>
    %cst_18 = arith.constant 6.400000e+01 : f32
    %42 = vector.broadcast %cst_18 : f32 to vector<128x1xf32>
    %43 = arith.divf %41, %42 : vector<128x1xf32>
    %44 = vector.broadcast %43 : vector<128x1xf32> to vector<128x64xf32>
    %45 = arith.subf %36, %44 : vector<128x64xf32>
    %46 = arith.mulf %45, %45 : vector<128x64xf32>
    %cst_19 = arith.constant dense<0.000000e+00> : vector<128xf32>
    %47 = vector.multi_reduction <add>, %46, %cst_19 [1] : vector<128x64xf32> to vector<128xf32>
    %48 = vector.shape_cast %47 : vector<128xf32> to vector<128x1xf32>
    %cst_20 = arith.constant 6.400000e+01 : f32
    %49 = vector.broadcast %cst_20 : f32 to vector<128x1xf32>
    %50 = arith.divf %48, %49 : vector<128x1xf32>
    %51 = vector.broadcast %43 : vector<128x1xf32> to vector<128x64xf32>
    %52 = arith.subf %36, %51 : vector<128x64xf32>
    %cst_21 = arith.constant 9.99999997E-7 : f32
    %53 = vector.broadcast %cst_21 : f32 to vector<128x1xf32>
    %54 = arith.addf %50, %53 : vector<128x1xf32>
    %55 = math.rsqrt %54 : vector<128x1xf32>
    %56 = vector.broadcast %55 : vector<128x1xf32> to vector<128x64xf32>
    %57 = arith.mulf %52, %56 : vector<128x64xf32>
    %58 = vector.extract_strided_slice %39 {offsets = [0, 0], sizes = [1, 64], strides = [1, 1]} : vector<4x64xf32> to vector<1x64xf32>
    %59 = vector.broadcast %58 : vector<1x64xf32> to vector<128x64xf32>
    %60 = arith.mulf %57, %59 : vector<128x64xf32>
    %61 = vector.extract_strided_slice %39 {offsets = [1, 0], sizes = [1, 64], strides = [1, 1]} : vector<4x64xf32> to vector<1x64xf32>
    %62 = vector.broadcast %61 : vector<1x64xf32> to vector<128x64xf32>
    %63 = arith.addf %60, %62 : vector<128x64xf32>
    %cst_22 = arith.constant 2.500000e-01 : f32
    %64 = vector.broadcast %cst_22 : f32 to vector<128x64xf32>
    %65 = arith.mulf %63, %64 : vector<128x64xf32>
    %cst_23 = arith.constant dense<0.000000e+00> : vector<128xf32>
    %66 = vector.multi_reduction <add>, %37, %cst_23 [1] : vector<128x64xf32> to vector<128xf32>
    %67 = vector.shape_cast %66 : vector<128xf32> to vector<128x1xf32>
    %cst_24 = arith.constant 6.400000e+01 : f32
    %68 = vector.broadcast %cst_24 : f32 to vector<128x1xf32>
    %69 = arith.divf %67, %68 : vector<128x1xf32>
    %70 = vector.broadcast %69 : vector<128x1xf32> to vector<128x64xf32>
    %71 = arith.subf %37, %70 : vector<128x64xf32>
    %72 = arith.mulf %71, %71 : vector<128x64xf32>
    %cst_25 = arith.constant dense<0.000000e+00> : vector<128xf32>
    %73 = vector.multi_reduction <add>, %72, %cst_25 [1] : vector<128x64xf32> to vector<128xf32>
    %74 = vector.shape_cast %73 : vector<128xf32> to vector<128x1xf32>
    %cst_26 = arith.constant 6.400000e+01 : f32
    %75 = vector.broadcast %cst_26 : f32 to vector<128x1xf32>
    %76 = arith.divf %74, %75 : vector<128x1xf32>
    %77 = vector.broadcast %69 : vector<128x1xf32> to vector<128x64xf32>
    %78 = arith.subf %37, %77 : vector<128x64xf32>
    %cst_27 = arith.constant 9.99999997E-7 : f32
    %79 = vector.broadcast %cst_27 : f32 to vector<128x1xf32>
    %80 = arith.addf %76, %79 : vector<128x1xf32>
    %81 = math.rsqrt %80 : vector<128x1xf32>
    %82 = vector.broadcast %81 : vector<128x1xf32> to vector<128x64xf32>
    %83 = arith.mulf %78, %82 : vector<128x64xf32>
    %84 = vector.extract_strided_slice %39 {offsets = [2, 0], sizes = [1, 64], strides = [1, 1]} : vector<4x64xf32> to vector<1x64xf32>
    %85 = vector.broadcast %84 : vector<1x64xf32> to vector<128x64xf32>
    %86 = arith.mulf %83, %85 : vector<128x64xf32>
    %87 = vector.extract_strided_slice %39 {offsets = [3, 0], sizes = [1, 64], strides = [1, 1]} : vector<4x64xf32> to vector<1x64xf32>
    %88 = vector.broadcast %87 : vector<1x64xf32> to vector<128x64xf32>
    %89 = arith.addf %86, %88 : vector<128x64xf32>
    %90 = arith.truncf %65 : vector<128x64xf32> to vector<128x64xbf16>
    %c0_28 = arith.constant 0 : index
    %c0_29 = arith.constant 0 : index
    %c0_30 = arith.constant 0 : index
    %91 = vector.load %arg7[%c0_28, %c0_29, %c0_30] : memref<1x128x64xbf16, #tpu.memory_space<vmem>>, vector<1x128x64xbf16>
    %92 = vector.shape_cast %91 : vector<1x128x64xbf16> to vector<128x64xbf16>
    %93 = vector.shape_cast %90 : vector<128x64xbf16> to vector<1x128x64xbf16>
    tpu.vector_store %arg7[%c0_28, %c0_29, %c0_30], %93 {strides = array<i32>} : memref<1x128x64xbf16, #tpu.memory_space<vmem>>, vector<1x128x64xbf16>,
    %94 = arith.truncf %89 : vector<128x64xf32> to vector<128x64xbf16>
    %c0_31 = arith.constant 0 : index
    %c0_32 = arith.constant 0 : index
    %c0_33 = arith.constant 0 : index
    %95 = vector.load %arg8[%c0_31, %c0_32, %c0_33] : memref<1x128x64xbf16, #tpu.memory_space<vmem>>, vector<1x128x64xbf16>
    %96 = vector.shape_cast %95 : vector<1x128x64xbf16> to vector<128x64xbf16>
    %97 = vector.shape_cast %94 : vector<128x64xbf16> to vector<1x128x64xbf16>
    tpu.vector_store %arg8[%c0_31, %c0_32, %c0_33], %97 {strides = array<i32>} : memref<1x128x64xbf16, #tpu.memory_space<vmem>>, vector<1x128x64xbf16>,
    %98 = arith.truncf %38 : vector<128x64xf32> to vector<128x64xbf16>
    %c0_34 = arith.constant 0 : index
    %c0_35 = arith.constant 0 : index
    %c0_36 = arith.constant 0 : index
    %99 = vector.load %arg9[%c0_34, %c0_35, %c0_36] : memref<1x128x64xbf16, #tpu.memory_space<vmem>>, vector<1x128x64xbf16>
    %100 = vector.shape_cast %99 : vector<1x128x64xbf16> to vector<128x64xbf16>
    %101 = vector.shape_cast %98 : vector<128x64xbf16> to vector<1x128x64xbf16>
    tpu.vector_store %arg9[%c0_34, %c0_35, %c0_36], %101 {strides = array<i32>} : memref<1x128x64xbf16, #tpu.memory_space<vmem>>, vector<1x128x64xbf16>,
    return
  }
  func.func @transform_0(%arg0: i32, %arg1: i32) -> (i32, i32, i32) {
    %c0_i32 = arith.constant 0 : i32
    %c0_i32_0 = arith.constant 0 : i32
    return %arg0, %arg1, %c0_i32 : i32, i32, i32
  }
  func.func @transform_1(%arg0: i32, %arg1: i32) -> (i32, i32, i32) {
    %c0_i32 = arith.constant 0 : i32
    %c0_i32_0 = arith.constant 0 : i32
    %c0_i32_1 = arith.constant 0 : i32
    return %arg0, %c0_i32, %c0_i32_0 : i32, i32, i32
  }
  func.func @transform_2(%arg0: i32, %arg1: i32) -> (i32, i32) {
    %c0_i32 = arith.constant 0 : i32
    %c0_i32_0 = arith.constant 0 : i32
    %c0_i32_1 = arith.constant 0 : i32
    return %c0_i32, %c0_i32_0 : i32, i32
  }
  func.func @transform_3(%arg0: i32, %arg1: i32) -> (i32, i32) {
    %c0_i32 = arith.constant 0 : i32
    %c0_i32_0 = arith.constant 0 : i32
    %c0_i32_1 = arith.constant 0 : i32
    return %c0_i32, %c0_i32_0 : i32, i32
  }
  func.func @transform_4(%arg0: i32, %arg1: i32) -> (i32, i32) {
    %c0_i32 = arith.constant 0 : i32
    %c0_i32_0 = arith.constant 0 : i32
    %c0_i32_1 = arith.constant 0 : i32
    return %c0_i32, %c0_i32_0 : i32, i32
  }
  func.func @transform_5(%arg0: i32, %arg1: i32) -> (i32, i32, i32) {
    %c0_i32 = arith.constant 0 : i32
    %c0_i32_0 = arith.constant 0 : i32
    return %arg0, %arg1, %c0_i32 : i32, i32, i32
  }
  func.func @transform_6(%arg0: i32, %arg1: i32) -> (i32, i32, i32) {
    %c0_i32 = arith.constant 0 : i32
    %c0_i32_0 = arith.constant 0 : i32
    return %arg0, %arg1, %c0_i32 : i32, i32, i32
  }
  func.func @transform_7(%arg0: i32, %arg1: i32) -> (i32, i32, i32) {
    %c0_i32 = arith.constant 0 : i32
    %c0_i32_0 = arith.constant 0 : i32
    return %arg0, %arg1, %c0_i32 : i32, i32, i32
  }
}

</mosaic_0001>

<bundles_post_ra>
// kernel: tpu_custom_call.1
= control target key start
LH: loop header
LB: loop body
LE: loop exit
PB: predicated region body
PF: predicated region fallthrough
CT: control target
= control target key end

     0   :  { %s2352_s24 = smov 0   ;;  %s2354_s25 = smov 0   ;;  %s3339_s0 = inlined_call_operand.vmem [shape: f32[2,256,64], index: 0, kind: input, shape index: {}]   ;;  %s3340_s1 = inlined_call_operand.vmem [shape: f32[2,6,64], index: 1, kind: input, shape index: {}]   ;;  %s3341_s2 = inlined_call_operand.vmem [shape: bf16[64,192], index: 2, kind: input, shape index: {}]   ;;  %s3342_s3 = inlined_call_operand.vmem [shape: f32[1,192], index: 3, kind: input, shape index: {}]   ;;  %s3343_s4 = inlined_call_operand.vmem [shape: f32[4,64], index: 4, kind: input, shape index: {}]   ;;  %s3344_s5 = inlined_call_operand.vmem [shape: bf16[2,256,64], index: 5, kind: output, shape index: {0}]   ;;  %s3345_s6 = inlined_call_operand.vmem [shape: bf16[2,256,64], index: 6, kind: output, shape index: {1}]   ;;  %s3346_s7 = inlined_call_operand.vmem [shape: bf16[2,256,64], index: 7, kind: output, shape index: {2}]  }
   0x1   :  { %s2356_s26 = smov 0   ;;  %s2358_s27 = smov 0  }
   0x2   :  { %s2360_s28 = smov 0  }
   0x3 LB: > { %s27_s29 = sadd.s32 1, %s2300_s26  ;;  %s30_s30 = sadd.s32 1, %s2304_s27  ;;  %s2308_s28 = sphi %s2360_s28, %s18_s28   ;;  %s2304_s27 = sphi %s2358_s27, %s3350_s27   ;;  %s2300_s26 = sphi %s2356_s26, %s3349_s26   ;;  %s2296_s25 = sphi %s2354_s25, %s3348_s25   ;;  %s2292_s24 = sphi %s2352_s24, %s3347_s24  }
   0x4   : > { %p28_p0 = scmp.ge.s32.totalorder %s27_s29, 2  ;;  %p1984_p1 = scmp.ge.s32.totalorder %s2308_s28, 1 }
   0x5   : > { %p276_p2 = scmp.lt.s32.totalorder %s2308_s28, 5 }
   0x6   : > { %s3352_s29 = smov (%p28_p0, %s27_s29), 0  ;;  %s3354_s30 = smov (!%p28_p0, %s30_s30), %s2304_s27 }
   0x7   : > { %p277_p3 = pnand %p1984_p1, %p276_p2  ;;  %p32_p4 = scmp.ge.s32.totalorder %s3354_s30, 2 }
   0x8   : > { %s1985_s8 = sshll.u32 (!%p277_p3), %s2292_s24, 4  ;;  %p339_p5 = scmp.lt.s32.totalorder (!%p277_p3), %s2296_s25, 1 }
   0x9   : > { %s3356_s30 = smov (%p32_p4, %s3354_s30), 0  ;;  %280 = sbr.rel (%p277_p3) target bundleno = 1394 (0x572), region = 40 }
   0xa   : > { %p341_p6 = scmp.lt.s32.totalorder (!%p277_p3), %s1985_s8, 31  ;;  %s2311_s21 = smov (!%p277_p3), 64  }
   0xe   : > { %s3358_s25 = smov (!%p339_p5, %s2296_s25), 1  ;;  %s3360_s8 = smov (!%p341_p6, %s1985_s8), 31  ;;  %vm400_vm0 = vcmask 523264   ;;  %vm1569_vm1 = vcmask 519168  }
   0xf   : > { %s1986_s9 = sshll.u32 %s3358_s25, 5  ;;  %s1988_s15 = sshll.u32 %s3358_s25, 3 }
  0x10   : > { %s2385_s10 = sadd.s32 %s1986_s9, %s3360_s8  ;;  %s351_s18 = scalar_lea.vmem %s3340_s1, %s1988_s15 }
  0x11   : > { %s1987_s11 = sshll.u32 %s2385_s10, 3  ;;  %s2661_s20 = sshll.u32 %s2385_s10, 2 }
  0x12   : > { %s2391_s14 = scalar_lea.vmem %s3339_s0, %s1987_s11  ;;  %s2673_s24 = scalar_lea.vmem %s3346_s7, %s2661_s20 }
  0x13   : > { %v383_v0 = vld [vmem:[%s2391_s14] sm:$0xff]  ;;  %v384_v2 = vld [vmem:[%s2391_s14 + $0x8] sm:$0xff]  ;;  %v385_v8 = vld [vmem:[%s2391_s14 + $0x10] sm:$0xff]  ;;  %s3197_s12 = scalar_lea.vmem %s3344_s5, %s2661_s20  ;;  %s3290_s15 = scalar_lea.vmem %s3345_s6, %s2661_s20 }
  0x14   : > { %v391_v1 = vld [vmem:[%s2391_s14 + $0x40] sm:$0xff]  ;;  %v401_v3 = vsel %vm400_vm0, %v383_v0, 0.0  ;;  %v392_v5 = vld [vmem:[%s2391_s14 + $0x48] sm:$0xff]  ;;  %v404_v6 = vsel %vm400_vm0, %v384_v2, 0.0  ;;  %v386_v9 = vld [vmem:[%s2391_s14 + $0x18] sm:$0xff]  ;;  %v407_v10 = vsel %vm400_vm0, %v385_v8, 0.0 }
  0x15   : > { %v425_v4 = vsel %vm400_vm0, %v391_v1, 0.0  ;;  %402 = vadd.xlane.f32.xlu0 %v401_v3  ;;  %v428_v7 = vsel %vm400_vm0, %v392_v5, 0.0  ;;  %v410_v11 = vsel %vm400_vm0, %v386_v9, 0.0  ;;  %v2406_v12 = vld [vmem:[%s2391_s14 + $0x50] sm:$0xff]  ;;  %v2409_v13 = vld [vmem:[%s2391_s14 + $0x58] sm:$0xff]  ;;  %v2416_v16 = vld [vmem:[%s2391_s14 + $0x20] sm:$0xff] }
  0x16   : > { %426 = vadd.xlane.f32.xlu1 %v425_v4  ;;  %v431_v14 = vsel %vm400_vm0, %v2406_v12, 0.0  ;;  %v434_v15 = vsel %vm400_vm0, %v2409_v13, 0.0  ;;  %v2419_v17 = vld [vmem:[%s2391_s14 + $0x28] sm:$0xff]  ;;  %v413_v18 = vsel %vm400_vm0, %v2416_v16, 0.0  ;;  %v2426_v20 = vld [vmem:[%s2391_s14 + $0x60] sm:$0xff]  ;;  %v2436_v24 = vld [vmem:[%s2391_s14 + $0x30] sm:$0xff] }
  0x17   : > { %v416_v19 = vsel %vm400_vm0, %v2419_v17, 0.0  ;;  %v2429_v21 = vld [vmem:[%s2391_s14 + $0x68] sm:$0xff]  ;;  %v437_v22 = vsel %vm400_vm0, %v2426_v20, 0.0  ;;  %v2439_v25 = vld [vmem:[%s2391_s14 + $0x38] sm:$0xff]  ;;  %v419_v26 = vsel %vm400_vm0, %v2436_v24, 0.0  ;;  %v2446_v28 = vld [vmem:[%s2391_s14 + $0x70] sm:$0xff] }
  0x18   : > { %v440_v23 = vsel %vm400_vm0, %v2429_v21, 0.0  ;;  %v422_v27 = vsel %vm400_vm0, %v2439_v25, 0.0  ;;  %v2449_v29 = vld [vmem:[%s2391_s14 + $0x78] sm:$0xff]  ;;  %v443_v30 = vsel %vm400_vm0, %v2446_v28, 0.0 }
  0x19   : > { %405 = vadd.xlane.f32.xlu0 %v404_v6  ;;  %v446_v31 = vsel %vm400_vm0, %v2449_v29, 0.0 }
  0x1a   : > { %429 = vadd.xlane.f32.xlu1 %v428_v7 }
  0x1d   : > { %408 = vadd.xlane.f32.xlu0 %v407_v10 }
  0x1e   : > { %411 = vadd.xlane.f32.xlu1 %v410_v11 }
  0x21   : > { %432 = vadd.xlane.f32.xlu0 %v431_v14 }
  0x22   : > { %435 = vadd.xlane.f32.xlu1 %v434_v15 }
  0x25   : > { %414 = vadd.xlane.f32.xlu0 %v413_v18 }
  0x26   : > { %417 = vadd.xlane.f32.xlu1 %v416_v19 }
  0x29   : > { %438 = vadd.xlane.f32.xlu0 %v437_v22 }
  0x2a   : > { %441 = vadd.xlane.f32.xlu1 %v440_v23 }
  0x2d   : > { %420 = vadd.xlane.f32.xlu0 %v419_v26 }
  0x2e   : > { %423 = vadd.xlane.f32.xlu1 %v422_v27 }
  0x31   : > { %444 = vadd.xlane.f32.xlu0 %v443_v30 }
  0x32   : > { %447 = vadd.xlane.f32.xlu1 %v446_v31 }
  0x9e   : > { %v403_v32 = vpop.xlane.xlu0 %402 }
  0x9f   : > { %v427_v33 = vpop.xlane.xlu1 %426  ;;  %v450_v34 = vmul.f32 0.015625, %v403_v32 }
  0xa0   : > { %v458_v35 = vmul.f32 0.015625, %v427_v33 }
  0xa1   : > { %v2455_v36 = vsub.f32 %v383_v0, %v450_v34 }
  0xa2   : > { %v2457_v37 = vsub.f32 %v391_v1, %v458_v35  ;;  %v406_v38 = vpop.xlane.xlu0 %405 }
  0xa3   : > { %v430_v39 = vpop.xlane.xlu1 %429  ;;  %v451_v40 = vmul.f32 0.015625, %v406_v38  ;;  %v482_v42 = vmul.f32 %v2455_v36, %v2455_v36 }
  0xa4   : > { %v459_v41 = vmul.f32 0.015625, %v430_v39  ;;  %v490_v43 = vmul.f32 %v2457_v37, %v2457_v37 }
  0xa5   : > { %v2463_v44 = vsub.f32 %v384_v2, %v451_v40  ;;  %v498_v46 = vsel %vm400_vm0, %v482_v42, 0.0 }
  0xa6   : > { %v2465_v45 = vsub.f32 %v392_v5, %v459_v41  ;;  %499 = vadd.xlane.f32.xlu0 %v498_v46  ;;  %v409_v47 = vpop.xlane.xlu0 %408  ;;  %v522_v49 = vsel %vm400_vm0, %v490_v43, 0.0 }
  0xa7   : > { %v412_v48 = vpop.xlane.xlu1 %411  ;;  %v452_v50 = vmul.f32 0.015625, %v409_v47  ;;  %v483_v52 = vmul.f32 %v2463_v44, %v2463_v44 }
  0xa8   : > { %v453_v51 = vmul.f32 0.015625, %v412_v48  ;;  %v491_v53 = vmul.f32 %v2465_v45, %v2465_v45 }
  0xa9   : > { %v2473_v54 = vsub.f32 %v385_v8, %v452_v50  ;;  %v501_v56 = vsel %vm400_vm0, %v483_v52, 0.0  ;;  %v2164_v50 = vld [vmem:[%s3341_s2 + $0x30] ss:$8 sps:$4 sm:$0xff]  }
  0xaa   : > { %v2475_v55 = vsub.f32 %v386_v9, %v453_v51  ;;  %523 = vadd.xlane.f32.xlu0 %v522_v49  ;;  %502 = vadd.xlane.f32.xlu1 %v501_v56  ;;  %v433_v57 = vpop.xlane.xlu0 %432  ;;  %v525_v59 = vsel %vm400_vm0, %v491_v53, 0.0  ;;  %v2162_v49 = vld [vmem:[%s3341_s2 + $0x34] ss:$8 sps:$4 sm:$0xff]   ;;  %v2165_v53 = vld [vmem:[%s3341_s2 + $0x24] ss:$8 sps:$4 sm:$0xff]  }
  0xab   : > { %v436_v58 = vpop.xlane.xlu1 %435  ;;  %v460_v60 = vmul.f32 0.015625, %v433_v57  ;;  %v484_v62 = vmul.f32 %v2473_v54, %v2473_v54  ;;  %751 = vmatprep.subr.bf16.mxu0 %v2162_v49  ;;  %2112 = vmatprep.subr.bf16.mxu1 %v2162_v49  ;;  %v2167_v56 = vld [vmem:[%s3341_s2 + $0x20] ss:$8 sps:$4 sm:$0xff]  }
  0xac   : > { %v461_v61 = vmul.f32 0.015625, %v436_v58  ;;  %v485_v63 = vmul.f32 %v2475_v55, %v2475_v55  ;;  %752 = vmatpush1.bf16.msra.mxu0 %v2164_v50  ;;  %2116 = vmatpush1.bf16.msra.mxu1 %v2164_v50  ;;  %v2168_v58 = vld [vmem:[%s3341_s2 + $0x14] ss:$8 sps:$4 sm:$0xff]  }
  0xad   : > { %v2484_v0 = vsub.f32 %v2406_v12, %v460_v60  ;;  %v504_v2 = vsel %vm400_vm0, %v484_v62, 0.0  ;;  %753 = vmatprep.subr.bf16.mxu0 %v2165_v53  ;;  %2113 = vmatprep.subr.bf16.mxu1 %v2165_v53  ;;  %v2171_v60 = vld [vmem:[%s3341_s2 + $0x4] ss:$8 sps:$4 sm:$0xff]   ;;  %v2310_v62 = vmov 0  }
  0xae   : > { %v2487_v1 = vsub.f32 %v2409_v13, %v461_v61  ;;  %526 = vadd.xlane.f32.xlu1 %v525_v59  ;;  %505 = vadd.xlane.f32.xlu0 %v504_v2  ;;  %v415_v3 = vpop.xlane.xlu0 %414  ;;  %v507_v5 = vsel %vm400_vm0, %v485_v63, 0.0  ;;  %v2170_v59 = vld [vmem:[%s3341_s2 + $0x10] ss:$8 sps:$4 sm:$0xff]   ;;  %v2173_v61 = vld [vmem:[%s3341_s2] ss:$8 sps:$4 sm:$0xff]  }
  0xaf   : > { %v418_v4 = vpop.xlane.xlu1 %417  ;;  %v454_v6 = vmul.f32 0.015625, %v415_v3  ;;  %v492_v8 = vmul.f32 %v2484_v0, %v2484_v0  ;;  %775 = vmatprep.mubr.bf16.mxu0 %v2310_v62  ;;  %815 = vmatprep.mubr.bf16.mxu1 %v2310_v62 }
  0xb0   : > { %v455_v7 = vmul.f32 0.015625, %v418_v4  ;;  %v493_v9 = vmul.f32 %v2487_v1, %v2487_v1  ;;  %754 = vmatpush1.bf16.msra.mxu0 %v2167_v56  ;;  %2117 = vmatpush1.bf16.msra.mxu1 %v2167_v56 }
  0xb1   : > { %v2496_v10 = vsub.f32 %v2416_v16, %v454_v6  ;;  %v528_v12 = vsel %vm400_vm0, %v492_v8, 0.0  ;;  %755 = vmatprep.subr.bf16.mxu0 %v2168_v58  ;;  %2114 = vmatprep.subr.bf16.mxu1 %v2168_v58  ;;  %v611_v8 = vlaneseq }
  0xb2   : > { %v2499_v11 = vsub.f32 %v2419_v17, %v455_v7  ;;  %508 = vadd.xlane.f32.xlu1 %v507_v5  ;;  %529 = vadd.xlane.f32.xlu0 %v528_v12  ;;  %v439_v13 = vpop.xlane.xlu0 %438  ;;  %v531_v15 = vsel %vm400_vm0, %v493_v9, 0.0 }
  0xb3   : > { %v442_v14 = vpop.xlane.xlu1 %441  ;;  %v462_v18 = vmul.f32 0.015625, %v439_v13  ;;  %v486_v22 = vmul.f32 %v2496_v10, %v2496_v10 }
  0xb4   : > { %v463_v19 = vmul.f32 0.015625, %v442_v14  ;;  %v487_v16 = vmul.f32 %v2499_v11, %v2499_v11  ;;  %756 = vmatpush1.bf16.msra.mxu0 %v2170_v59  ;;  %2118 = vmatpush1.bf16.msra.mxu1 %v2170_v59 }
  0xb5   : > { %v2508_v23 = vsub.f32 %v2426_v20, %v462_v18  ;;  %v510_v26 = vsel %vm400_vm0, %v486_v22, 0.0  ;;  %757 = vmatprep.subr.bf16.mxu0 %v2171_v60  ;;  %2115 = vmatprep.subr.bf16.mxu1 %v2171_v60  ;;  %v399_v22 = vld [vmem:[%s351_s18] sm:$0x3f] }
  0xb6   : > { %v2511_v17 = vsub.f32 %v2429_v21, %v463_v19  ;;  %532 = vadd.xlane.f32.xlu1 %v531_v15  ;;  %511 = vadd.xlane.f32.xlu0 %v510_v26  ;;  %v421_v27 = vpop.xlane.xlu0 %420  ;;  %v513_v31 = vsel %vm400_vm0, %v487_v16, 0.0  ;;  %v2575_v19 = vshrl.u32 %v611_v8, 7 }
  0xb7   : > { %v424_v30 = vpop.xlane.xlu1 %423  ;;  %v456_v32 = vmul.f32 0.015625, %v421_v27  ;;  %v494_v34 = vmul.f32 %v2508_v23, %v2508_v23 }
  0xb8   : > { %v457_v33 = vmul.f32 0.015625, %v424_v30  ;;  %v495_v20 = vmul.f32 %v2511_v17, %v2511_v17  ;;  %758 = vmatpush1.bf16.msra.mxu0 %v2173_v61  ;;  %2119 = vmatpush1.bf16.msra.mxu1 %v2173_v61 }
  0xb9   : > { %v2520_v35 = vsub.f32 %v2436_v24, %v456_v32  ;;  %v534_v38 = vsel %vm400_vm0, %v494_v34, 0.0  ;;  %v2578_v34 = vsub.s32 1, %v2575_v19 }
  0xba   : > { %v2523_v21 = vsub.f32 %v2439_v25, %v457_v33  ;;  %514 = vadd.xlane.f32.xlu1 %v513_v31  ;;  %535 = vadd.xlane.f32.xlu0 %v534_v38  ;;  %v445_v39 = vpop.xlane.xlu0 %444  ;;  %v537_v41 = vsel %vm400_vm0, %v495_v20, 0.0  ;;  %v610_v33 = vadd.f32 1.0, %v399_v22 }
  0xbb   : > { %v448_v40 = vpop.xlane.xlu1 %447  ;;  %v464_v42 = vmul.f32 0.015625, %v445_v39  ;;  %v488_v46 = vmul.f32 %v2520_v35, %v2520_v35 }
  0xbc   : > { %v465_v43 = vmul.f32 0.015625, %v448_v40  ;;  %v489_v24 = vmul.f32 %v2523_v21, %v2523_v21 }
  0xbd   : > { %v2532_v47 = vsub.f32 %v2446_v28, %v464_v42  ;;  %v516_v48 = vsel %vm400_vm0, %v488_v46, 0.0  ;;  %v2581_v46 = vrot.slane %v610_v33, %v2578_v34 }
  0xbe   : > { %v2535_v25 = vsub.f32 %v2449_v29, %v465_v43  ;;  %538 = vadd.xlane.f32.xlu1 %v537_v41  ;;  %517 = vadd.xlane.f32.xlu0 %v516_v48  ;;  %v519_v51 = vsel %vm400_vm0, %v489_v24, 0.0  ;;  %v2584_v24 = vsub.s32 0, %v2575_v19 }
  0xbf   : > { %v496_v28 = vmul.f32 %v2532_v47, %v2532_v47 }
  0xc0   : > { %v497_v29 = vmul.f32 %v2535_v25, %v2535_v25  ;;  %v2588_v56 = vrot.slane %v399_v22, %v2584_v24 }
  0xc1   : > { %v540_v52 = vsel %vm400_vm0, %v496_v28, 0.0 }
  0xc2   : > { %520 = vadd.xlane.f32.xlu1 %v519_v51  ;;  %541 = vadd.xlane.f32.xlu0 %v540_v52  ;;  %v543_v57 = vsel %vm400_vm0, %v497_v29, 0.0 }
  0xc6   : > { %544 = vadd.xlane.f32.xlu1 %v543_v57 }
 0x12f   : > { %v500_v63 = vpop.xlane.xlu0 %499 }
 0x130   : > { %v546_v2 = vmul.f32 0.015625, %v500_v63 }
 0x132   : > { %v562_v3 = vadd.f32 1e-06, %v546_v2 }
 0x133   : > { %v503_v4 = vpop.xlane.xlu1 %502  ;;  %v524_v5 = vpop.xlane.xlu0 %523 }
 0x134   : > { %2174 = vrsqrt.f32 %v562_v3  ;;  %v547_v6 = vmul.f32 0.015625, %v503_v4  ;;  %v554_v7 = vmul.f32 0.015625, %v524_v5 }
 0x136   : > { %v563_v9 = vadd.f32 1e-06, %v547_v6  ;;  %v570_v12 = vadd.f32 1e-06, %v554_v7 }
 0x137   : > { %v527_v13 = vpop.xlane.xlu1 %526  ;;  %v506_v14 = vpop.xlane.xlu0 %505 }
 0x138   : > { %2176 = vrsqrt.f32 %v563_v9  ;;  %v555_v15 = vmul.f32 0.015625, %v527_v13  ;;  %v548_v18 = vmul.f32 0.015625, %v506_v14 }
 0x139   : > { %2178 = vrsqrt.f32 %v570_v12 }
 0x13a   : > { %v571_v16 = vadd.f32 1e-06, %v555_v15  ;;  %v564_v26 = vadd.f32 1e-06, %v548_v18 }
 0x13b   : > { %v509_v27 = vpop.xlane.xlu1 %508  ;;  %v530_v30 = vpop.xlane.xlu0 %529 }
 0x13c   : > { %2180 = vrsqrt.f32 %v571_v16  ;;  %v549_v31 = vmul.f32 0.015625, %v509_v27  ;;  %v556_v32 = vmul.f32 0.015625, %v530_v30 }
 0x13d   : > { %2182 = vrsqrt.f32 %v564_v26 }
 0x13e   : > { %v565_v20 = vadd.f32 1e-06, %v549_v31  ;;  %v572_v38 = vadd.f32 1e-06, %v556_v32 }
 0x13f   : > { %v533_v39 = vpop.xlane.xlu1 %532  ;;  %v512_v40 = vpop.xlane.xlu0 %511 }
 0x140   : > { %2184 = vrsqrt.f32 %v565_v20  ;;  %v557_v41 = vmul.f32 0.015625, %v533_v39  ;;  %v550_v42 = vmul.f32 0.015625, %v512_v40 }
 0x141   : > { %v2175_v43 = vpop.eup %2174  ;;  %2186 = vrsqrt.f32 %v572_v38 }
 0x142   : > { %v573_v48 = vadd.f32 1e-06, %v557_v41  ;;  %v566_v49 = vadd.f32 1e-06, %v550_v42  ;;  %v594_v50 = vmul.f32 %v2175_v43, %v2455_v36 }
 0x143   : > { %v515_v51 = vpop.xlane.xlu1 %514  ;;  %v536_v28 = vpop.xlane.xlu0 %535 }
 0x144   : > { %2188 = vrsqrt.f32 %v573_v48  ;;  %v551_v29 = vmul.f32 0.015625, %v515_v51  ;;  %v558_v52 = vmul.f32 0.015625, %v536_v28  ;;  %v615_v57 = vmul.f32 %v2581_v46, %v594_v50 }
 0x145   : > { %v2177_v53 = vpop.eup %2176  ;;  %2190 = vrsqrt.f32 %v566_v49 }
 0x146   : > { %v2179_v58 = vpop.eup %2178  ;;  %v567_v59 = vadd.f32 1e-06, %v551_v29  ;;  %v574_v60 = vadd.f32 1e-06, %v558_v52  ;;  %v595_v61 = vmul.f32 %v2177_v53, %v2463_v44  ;;  %v635_v7 = vadd.f32 %v2588_v56, %v615_v57 }
 0x147   : > { %v539_v63 = vpop.xlane.xlu1 %538  ;;  %v518_v2 = vpop.xlane.xlu0 %517  ;;  %v602_v36 = vmul.f32 %v2179_v58, %v2457_v37 }
 0x148   : > { %2192 = vrsqrt.f32 %v567_v59  ;;  %v559_v3 = vmul.f32 0.015625, %v539_v63  ;;  %v552_v4 = vmul.f32 0.015625, %v518_v2  ;;  %v616_v5 = vmul.f32 %v2581_v46, %v595_v61 }
 0x149   : > { %v2181_v6 = vpop.eup %2180  ;;  %2194 = vrsqrt.f32 %v574_v60  ;;  %v623_v37 = vmul.f32 %v2581_v46, %v602_v36 }
 0x14a   : > { %v2183_v8 = vpop.eup %2182  ;;  %v575_v9 = vadd.f32 1e-06, %v559_v3  ;;  %v568_v12 = vadd.f32 1e-06, %v552_v4  ;;  %v636_v13 = vadd.f32 %v2588_v56, %v616_v5  ;;  %v603_v44 = vmul.f32 %v2181_v6, %v2465_v45 }
 0x14b   : > { %v521_v14 = vpop.xlane.xlu1 %520  ;;  %v542_v15 = vpop.xlane.xlu0 %541  ;;  %v596_v18 = vmul.f32 %v2183_v8, %v2473_v54  ;;  %v643_v54 = vadd.f32 %v2588_v56, %v623_v37 }
 0x14c   : > { %2196 = vrsqrt.f32 %v575_v9  ;;  %v553_v22 = vmul.f32 0.015625, %v521_v14  ;;  %v560_v16 = vmul.f32 0.015625, %v542_v15  ;;  %v651_v26 = vpack.c.bf16 %v636_v13, %v635_v7 }
 0x14d   : > { %v2185_v27 = vpop.eup %2184  ;;  %2198 = vrsqrt.f32 %v568_v12  ;;  %v624_v30 = vmul.f32 %v2581_v46, %v603_v44  ;;  %v617_v31 = vmul.f32 %v2581_v46, %v596_v18 }
 0x14e   : > { %v2187_v32 = vpop.eup %2186  ;;  %v569_v33 = vadd.f32 1e-06, %v553_v22  ;;  %v576_v20 = vadd.f32 1e-06, %v560_v16  ;;  %2006 = vmatmul.mubr.msk.bf16.vlgmr.msra.gmra.mxu0 %vm400_vm0, %v651_v26  ;;  %v597_v45 = vmul.f32 %v2185_v27, %v2475_v55 }
 0x14f   : > { %v545_v38 = vpop.xlane.xlu1 %544  ;;  %v644_v39 = vadd.f32 %v2588_v56, %v624_v30  ;;  %785 = vmatprep.mubr.bf16.mxu0 %v2310_v62  ;;  %v604_v40 = vmul.f32 %v2187_v32, %v2484_v0  ;;  %v637_v49 = vadd.f32 %v2588_v56, %v617_v31 }
 0x150   : > { %2200 = vrsqrt.f32 %v569_v33  ;;  %v561_v41 = vmul.f32 0.015625, %v545_v38  ;;  %v618_v42 = vmul.f32 %v2581_v46, %v597_v45 }
 0x151   : > { %v2189_v43 = vpop.eup %2188  ;;  %2202 = vrsqrt.f32 %v576_v20  ;;  %v655_v48 = vpack.c.bf16 %v644_v39, %v643_v54  ;;  %v625_v29 = vmul.f32 %v2581_v46, %v604_v40 }
 0x152   : > { %v2191_v50 = vpop.eup %2190  ;;  %v577_v55 = vadd.f32 1e-06, %v561_v41  ;;  %v638_v51 = vadd.f32 %v2588_v56, %v618_v42  ;;  %v605_v28 = vmul.f32 %v2189_v43, %v2487_v1 }
 0x153   : > { %2010 = vmatmul.mubr.msk.bf16.vlgmr.msra.gmra.mxu1 %vm400_vm0, %v655_v48  ;;  %v598_v0 = vmul.f32 %v2191_v50, %v2496_v10  ;;  %v645_v59 = vadd.f32 %v2588_v56, %v625_v29 }
 0x154   : > { %2204 = vrsqrt.f32 %v577_v55  ;;  %v652_v52 = vpack.c.bf16 %v638_v51, %v637_v49  ;;  %825 = vmatprep.mubr.bf16.mxu1 %v2310_v62  ;;  %v626_v53 = vmul.f32 %v2581_v46, %v605_v28 }
 0x155   : > { %v2193_v57 = vpop.eup %2192  ;;  %v619_v61 = vmul.f32 %v2581_v46, %v598_v0 }
 0x156   : > { %v2195_v58 = vpop.eup %2194  ;;  %2007 = vmatmul.mubr.msk.bf16.gmra.mxu0 %vm400_vm0, %v652_v52  ;;  %v646_v1 = vadd.f32 %v2588_v56, %v626_v53  ;;  %v599_v60 = vmul.f32 %v2193_v57, %v2499_v11 }
 0x157   : > { %795 = vmatprep.mubr.bf16.mxu0 %v2310_v62  ;;  %v606_v10 = vmul.f32 %v2195_v58, %v2508_v23  ;;  %v639_v4 = vadd.f32 %v2588_v56, %v619_v61 }
 0x158   : > { %v656_v63 = vpack.c.bf16 %v646_v1, %v645_v59  ;;  %v620_v2 = vmul.f32 %v2581_v46, %v599_v60 }
 0x159   : > { %v2197_v36 = vpop.eup %2196  ;;  %v627_v7 = vmul.f32 %v2581_v46, %v606_v10 }
 0x15a   : > { %v2199_v3 = vpop.eup %2198  ;;  %v640_v5 = vadd.f32 %v2588_v56, %v620_v2  ;;  %v607_v6 = vmul.f32 %v2197_v36, %v2511_v17 }
 0x15b   : > { %2011 = vmatmul.mubr.msk.bf16.gmra.mxu1 %vm400_vm0, %v656_v63  ;;  %v600_v11 = vmul.f32 %v2199_v3, %v2520_v35  ;;  %v647_v13 = vadd.f32 %v2588_v56, %v627_v7 }
 0x15c   : > { %v653_v8 = vpack.c.bf16 %v640_v5, %v639_v4  ;;  %835 = vmatprep.mubr.bf16.mxu1 %v2310_v62  ;;  %v628_v23 = vmul.f32 %v2581_v46, %v607_v6 }
 0x15d   : > { %v2201_v9 = vpop.eup %2200  ;;  %v621_v14 = vmul.f32 %v2581_v46, %v600_v11 }
 0x15e   : > { %v2203_v12 = vpop.eup %2202  ;;  %2008 = vmatmul.mubr.msk.bf16.gmra.mxu0 %vm400_vm0, %v653_v8  ;;  %v648_v44 = vadd.f32 %v2588_v56, %v628_v23  ;;  %v601_v17 = vmul.f32 %v2201_v9, %v2523_v21 }
 0x15f   : > { %805 = vmatprep.mubr.bf16.mxu0 %v2310_v62  ;;  %v608_v35 = vmul.f32 %v2203_v12, %v2532_v47  ;;  %v641_v22 = vadd.f32 %v2588_v56, %v621_v14 }
 0x160   : > { %v657_v15 = vpack.c.bf16 %v648_v44, %v647_v13  ;;  %v622_v37 = vmul.f32 %v2581_v46, %v601_v17 }
 0x161   : > { %v2205_v18 = vpop.eup %2204  ;;  %v629_v27 = vmul.f32 %v2581_v46, %v608_v35 }
 0x162   : > { %v642_v16 = vadd.f32 %v2588_v56, %v622_v37  ;;  %v609_v26 = vmul.f32 %v2205_v18, %v2535_v25  ;;  %v667_v25 = vld [vmem:[%s3342_s3] sm:$0x3] }
 0x163   : > { %2012 = vmatmul.mubr.msk.bf16.gmra.mxu1 %vm400_vm0, %v657_v15  ;;  %v649_v30 = vadd.f32 %v2588_v56, %v629_v27  ;;  %v2655_v33 = vrot.slane %v667_v25, %v2584_v24 }
 0x164   : > { %v654_v21 = vpack.c.bf16 %v642_v16, %v641_v22  ;;  %845 = vmatprep.mubr.bf16.mxu1 %v2310_v62  ;;  %v630_v47 = vmul.f32 %v2581_v46, %v609_v26  ;;  %v2658_v62 = vrot.slane %v667_v25, %v2578_v34 }
 0x166   : > { %2009 = vmatmul.mubr.msk.bf16.gmra.mxu0 %vm400_vm0, %v654_v21  ;;  %v650_v31 = vadd.f32 %v2588_v56, %v630_v47 }
 0x168   : > { %v658_v32 = vpack.c.bf16 %v650_v31, %v649_v30 }
 0x16b   : > { %2013 = vmatmul.mubr.msk.bf16.gmra.mxu1 %vm400_vm0, %v658_v32 }
 0x20e   : > { %v777_v46 = vpop.f32.mrf.mxu0 }
 0x20f   : > { %v2664_v20 = vadd.f32 %v777_v46, %v2655_v33 }
 0x210   : > { %v779_v56 = vpop.f32.mrf.mxu0 }
 0x211   : > { %v780_v45 = vadd.f32 %v779_v56, %v2658_v62  ;;  %1137 = vrot.lane.b32.xlu0 %v2664_v20, %s2311_s21 }
 0x212   : > { %v781_v38 = vpop.f32.mrf.mxu0 }
 0x213   : > { %v2096_v54 = vpack.c.bf16 %v780_v45, %v780_v45  ;;  %v2676_v39 = vadd.f32 %v781_v38, %v2655_v33  ;;  %v817_v40 = vpop.f32.mrf.mxu1 }
 0x214   : > { %v2679_v41 = vadd.f32 %v817_v40, %v2655_v33  ;;  %v783_v42 = vpop.f32.mrf.mxu0 }
 0x215   : > { %1762 = vst.msk [vmem:[%s2673_s24] sm:$0xf] %vm1569_vm1, %v2096_v54  ;;  %v784_v43 = vadd.f32 %v783_v42, %v2658_v62  ;;  %v819_v48 = vpop.f32.mrf.mxu1  ;;  %1139 = vrot.lane.b32.xlu1 %v2676_v39, %s2311_s21 }
 0x216   : > { %v820_v49 = vadd.f32 %v819_v48, %v2658_v62  ;;  %1153 = vrot.lane.b32.xlu0 %v2679_v41, %s2311_s21  ;;  %v2689_v50 = vpop.f32.mrf.mxu0 }
 0x217   : > { %v2097_v55 = vpack.c.bf16 %v784_v43, %v784_v43  ;;  %v821_v51 = vpop.f32.mrf.mxu1 }
 0x218   : > { %v2104_v28 = vpack.c.bf16 %v820_v49, %v820_v49  ;;  %v2692_v29 = vadd.f32 %v821_v51, %v2655_v33  ;;  %v789_v0 = vpop.f32.mrf.mxu0 }
 0x219   : > { %1763 = vst.msk [vmem:[%s2673_s24 + $0x4] sm:$0xf] %vm1569_vm1, %v2097_v55  ;;  %v790_v52 = vadd.f32 %v789_v0, %v2658_v62  ;;  %v823_v53 = vpop.f32.mrf.mxu1 }
 0x21a   : > { %1770 = vst.msk [vmem:[%s2673_s24 + $0x20] sm:$0xf] %vm1569_vm1, %v2104_v28  ;;  %v824_v57 = vadd.f32 %v823_v53, %v2658_v62  ;;  %1155 = vrot.lane.b32.xlu1 %v2692_v29, %s2311_s21  ;;  %v2702_v58 = vpop.f32.mrf.mxu0 }
 0x21b   : > { %v2098_v59 = vpack.c.bf16 %v790_v52, %v790_v52  ;;  %v2704_v1 = vpop.f32.mrf.mxu1 }
 0x21c   : > { %v2105_v60 = vpack.c.bf16 %v824_v57, %v824_v57  ;;  %v793_v61 = vpop.f32.mrf.mxu0 }
 0x21d   : > { %1764 = vst.msk [vmem:[%s2673_s24 + $0x8] sm:$0xf] %vm1569_vm1, %v2098_v59  ;;  %v794_v10 = vadd.f32 %v793_v61, %v2658_v62  ;;  %v829_v63 = vpop.f32.mrf.mxu1  ;;  %v857_v59 = vsel %vm400_vm0, %v2664_v20, 0.0  ;;  %v860_v61 = vsel %vm400_vm0, %v2676_v39, 0.0 }
 0x21e   : > { %1771 = vst.msk [vmem:[%s2673_s24 + $0x24] sm:$0xf] %vm1569_vm1, %v2105_v60  ;;  %v830_v2 = vadd.f32 %v829_v63, %v2658_v62  ;;  %v797_v36 = vpop.f32.mrf.mxu0  ;;  %v881_v60 = vsel %vm400_vm0, %v2679_v41, 0.0  ;;  %v2785_v63 = vadd.f32 %v2689_v50, %v2655_v33 }
 0x21f   : > { %v2099_v3 = vpack.c.bf16 %v794_v10, %v794_v10  ;;  %v2713_v4 = vadd.f32 %v797_v36, %v2655_v33  ;;  %v2715_v5 = vpop.f32.mrf.mxu1  ;;  %v884_v10 = vsel %vm400_vm0, %v2692_v29, 0.0 }
 0x220   : > { %v2106_v6 = vpack.c.bf16 %v830_v2, %v830_v2  ;;  %v799_v7 = vpop.f32.mrf.mxu0  ;;  %v2791_v2 = vadd.f32 %v2702_v58, %v2655_v33  ;;  %v863_v50 = vsel %vm400_vm0, %v2785_v63, 0.0 }
 0x221   : > { %1765 = vst.msk [vmem:[%s2673_s24 + $0xc] sm:$0xf] %vm1569_vm1, %v2099_v3  ;;  %v800_v11 = vadd.f32 %v799_v7, %v2658_v62  ;;  %v833_v8 = vpop.f32.mrf.mxu1 }
 0x222   : > { %1772 = vst.msk [vmem:[%s2673_s24 + $0x28] sm:$0xf] %vm1569_vm1, %v2106_v6  ;;  %v834_v23 = vadd.f32 %v833_v8, %v2658_v62  ;;  %v801_v9 = vpop.f32.mrf.mxu0  ;;  %v866_v58 = vsel %vm400_vm0, %v2791_v2, 0.0 }
 0x223   : > { %v2100_v12 = vpack.c.bf16 %v800_v11, %v800_v11  ;;  %v2724_v13 = vadd.f32 %v801_v9, %v2655_v33  ;;  %v837_v44 = vpop.f32.mrf.mxu1 }
 0x224   : > { %v2107_v17 = vpack.c.bf16 %v834_v23, %v834_v23  ;;  %v2727_v14 = vadd.f32 %v837_v44, %v2655_v33  ;;  %v803_v35 = vpop.f32.mrf.mxu0 }
 0x225   : > { %1766 = vst.msk [vmem:[%s2673_s24 + $0x10] sm:$0xf] %vm1569_vm1, %v2100_v12  ;;  %v804_v15 = vadd.f32 %v803_v35, %v2658_v62  ;;  %v839_v37 = vpop.f32.mrf.mxu1  ;;  %v872_v6 = vsel %vm400_vm0, %v2724_v13, 0.0 }
 0x226   : > { %1773 = vst.msk [vmem:[%s2673_s24 + $0x2c] sm:$0xf] %vm1569_vm1, %v2107_v17  ;;  %v840_v18 = vadd.f32 %v839_v37, %v2658_v62  ;;  %v807_v22 = vpop.f32.mrf.mxu0 }
 0x227   : > { %v2101_v16 = vpack.c.bf16 %v804_v15, %v804_v15  ;;  %v2736_v26 = vadd.f32 %v807_v22, %v2655_v33  ;;  %v841_v27 = vpop.f32.mrf.mxu1 }
 0x228   : > { %v2108_v21 = vpack.c.bf16 %v840_v18, %v840_v18  ;;  %v2739_v47 = vadd.f32 %v841_v27, %v2655_v33  ;;  %v809_v30 = vpop.f32.mrf.mxu0 }
 0x229   : > { %1767 = vst.msk [vmem:[%s2673_s24 + $0x14] sm:$0xf] %vm1569_vm1, %v2101_v16  ;;  %v810_v31 = vadd.f32 %v809_v30, %v2658_v62  ;;  %v843_v32 = vpop.f32.mrf.mxu1  ;;  %v875_v17 = vsel %vm400_vm0, %v2736_v26, 0.0 }
 0x22a   : > { %1774 = vst.msk [vmem:[%s2673_s24 + $0x30] sm:$0xf] %vm1569_vm1, %v2108_v21  ;;  %v844_v25 = vadd.f32 %v843_v32, %v2658_v62  ;;  %v811_v46 = vpop.f32.mrf.mxu0  ;;  %v896_v7 = vsel %vm400_vm0, %v2739_v47, 0.0 }
 0x22b   : > { %v2102_v56 = vpack.c.bf16 %v810_v31, %v810_v31  ;;  %v2748_v45 = vadd.f32 %v811_v46, %v2655_v33  ;;  %v847_v38 = vpop.f32.mrf.mxu1 }
 0x22c   : > { %v2109_v54 = vpack.c.bf16 %v844_v25, %v844_v25  ;;  %v2751_v40 = vadd.f32 %v847_v38, %v2655_v33  ;;  %v813_v42 = vpop.f32.mrf.mxu0 }
 0x22d   : > { %1768 = vst.msk [vmem:[%s2673_s24 + $0x18] sm:$0xf] %vm1569_vm1, %v2102_v56  ;;  %v814_v43 = vadd.f32 %v813_v42, %v2658_v62  ;;  %v849_v48 = vpop.f32.mrf.mxu1  ;;  %v878_v16 = vsel %vm400_vm0, %v2748_v45, 0.0 }
 0x22e   : > { %1775 = vst.msk [vmem:[%s2673_s24 + $0x34] sm:$0xf] %vm1569_vm1, %v2109_v54  ;;  %v850_v49 = vadd.f32 %v849_v48, %v2658_v62  ;;  %v899_v37 = vsel %vm400_vm0, %v2751_v40, 0.0 }
 0x22f   : > { %v2103_v55 = vpack.c.bf16 %v814_v43, %v814_v43  ;;  %v851_v51 = vpop.f32.mrf.mxu1 }
 0x230   : > { %v2110_v28 = vpack.c.bf16 %v850_v49, %v850_v49  ;;  %v2760_v0 = vadd.f32 %v851_v51, %v2655_v33 }
 0x231   : > { %1769 = vst.msk [vmem:[%s2673_s24 + $0x1c] sm:$0xf] %vm1569_vm1, %v2103_v55  ;;  %v853_v52 = vpop.f32.mrf.mxu1 }
 0x232   : > { %1776 = vst.msk [vmem:[%s2673_s24 + $0x38] sm:$0xf] %vm1569_vm1, %v2110_v28  ;;  %v854_v53 = vadd.f32 %v853_v52, %v2658_v62  ;;  %v2779_v62 = vadd.f32 %v2704_v1, %v2655_v33  ;;  %v2797_v1 = vadd.f32 %v2715_v5, %v2655_v33  ;;  %v869_v33 = vsel %vm400_vm0, %v2713_v4, 0.0 }
 0x233   : > { %v893_v5 = vsel %vm400_vm0, %v2727_v14, 0.0  ;;  %v902_v31 = vsel %vm400_vm0, %v2760_v0, 0.0 }
 0x234   : > { %v2111_v57 = vpack.c.bf16 %v854_v53, %v854_v53  ;;  %v887_v36 = vsel %vm400_vm0, %v2779_v62, 0.0  ;;  %v890_v3 = vsel %vm400_vm0, %v2797_v1, 0.0 }
 0x235   : > { %858 = vadd.xlane.f32.xlu0 %v857_v59 }
 0x236   : > { %1777 = vst.msk [vmem:[%s2673_s24 + $0x3c] sm:$0xf] %vm1569_vm1, %v2111_v57 }
 0x239   : > { %882 = vadd.xlane.f32.xlu0 %v881_v60 }
 0x23e   : > { %861 = vadd.xlane.f32.xlu1 %v860_v61 }
 0x242   : > { %885 = vadd.xlane.f32.xlu1 %v884_v10 }
 0x24f   : > { %1157 = vrot.lane.b32.xlu0 %v2779_v62, %s2311_s21 }
 0x253   : > { %1141 = vrot.lane.b32.xlu1 %v2785_v63, %s2311_s21 }
 0x257   : > { %1143 = vrot.lane.b32.xlu1 %v2791_v2, %s2311_s21 }
 0x25b   : > { %1159 = vrot.lane.b32.xlu1 %v2797_v1, %s2311_s21 }
 0x26e   : > { %864 = vadd.xlane.f32.xlu0 %v863_v50 }
 0x272   : > { %888 = vadd.xlane.f32.xlu0 %v887_v36 }
 0x276   : > { %867 = vadd.xlane.f32.xlu0 %v866_v58 }
 0x27f   : > { %891 = vadd.xlane.f32.xlu1 %v890_v3 }
 0x283   : > { %v1138_v11 = vpop.permute.xlu0 %1137 }
 0x284   : > { %v1185_v22 = vsel %vm400_vm0, %v1138_v11, 0.0 }
 0x287   : > { %v1140_v8 = vpop.permute.xlu1 %1139 }
 0x288   : > { %v1154_v23 = vpop.permute.xlu0 %1153  ;;  %v1188_v56 = vsel %vm400_vm0, %v1140_v8, 0.0 }
 0x289   : > { %v1209_v30 = vsel %vm400_vm0, %v1154_v23, 0.0 }
 0x28c   : > { %1145 = vrot.lane.b32.xlu0 %v2713_v4, %s2311_s21  ;;  %v1156_v9 = vpop.permute.xlu1 %1155 }
 0x28d   : > { %v1212_v42 = vsel %vm400_vm0, %v1156_v9, 0.0 }
 0x290   : > { %1147 = vrot.lane.b32.xlu1 %v2724_v13, %s2311_s21  ;;  %1161 = vrot.lane.b32.xlu0 %v2727_v14, %s2311_s21 }
 0x294   : > { %1163 = vrot.lane.b32.xlu1 %v2739_v47, %s2311_s21 }
 0x2af   : > { %870 = vadd.xlane.f32.xlu0 %v869_v33 }
 0x2b3   : > { %894 = vadd.xlane.f32.xlu0 %v893_v5 }
 0x2b8   : > { %873 = vadd.xlane.f32.xlu1 %v872_v6 }
 0x2bc   : > { %897 = vadd.xlane.f32.xlu1 %v896_v7 }
 0x2be   : > { %v2833_v12 = vpop.xlane.xlu0 %858 }
 0x2c2   : > { %v2839_v35 = vpop.xlane.xlu0 %882 }
 0x2c6   : > { %v1158_v18 = vpop.permute.xlu0 %1157 }
 0x2c7   : > { %v2835_v44 = vpop.xlane.xlu1 %861  ;;  %v1215_v54 = vsel %vm400_vm0, %v1158_v18, 0.0 }
 0x2c9   : > { %1149 = vrot.lane.b32.xlu0 %v2736_v26, %s2311_s21 }
 0x2cb   : > { %v2841_v15 = vpop.xlane.xlu1 %885 }
 0x2cd   : > { %1151 = vrot.lane.b32.xlu1 %v2748_v45, %s2311_s21  ;;  %1165 = vrot.lane.b32.xlu0 %v2751_v40, %s2311_s21 }
 0x2cf   : > { %v1142_v27 = vpop.permute.xlu1 %1141 }
 0x2d0   : > { %v1191_v46 = vsel %vm400_vm0, %v1142_v27, 0.0 }
 0x2d1   : > { %1167 = vrot.lane.b32.xlu1 %v2760_v0, %s2311_s21 }
 0x2d3   : > { %v1144_v32 = vpop.permute.xlu1 %1143 }
 0x2d4   : > { %v1194_v49 = vsel %vm400_vm0, %v1144_v32, 0.0 }
 0x2d7   : > { %v1160_v43 = vpop.permute.xlu1 %1159 }
 0x2d8   : > { %v1218_v55 = vsel %vm400_vm0, %v1160_v43, 0.0 }
 0x2ec   : > { %876 = vadd.xlane.f32.xlu0 %v875_v17 }
 0x2f0   : > { %900 = vadd.xlane.f32.xlu0 %v899_v37 }
 0x2f4   : > { %1186 = vadd.xlane.f32.xlu0 %v1185_v22 }
 0x2f5   : > { %879 = vadd.xlane.f32.xlu1 %v878_v16 }
 0x2f7   : > { %v2848_v21 = vpop.xlane.xlu0 %864 }
 0x2f8   : > { %1210 = vadd.xlane.f32.xlu0 %v1209_v30 }
 0x2f9   : > { %903 = vadd.xlane.f32.xlu1 %v902_v31 }
 0x2fb   : > { %v2853_v25 = vpop.xlane.xlu0 %888 }
 0x2fc   : > { %1192 = vadd.xlane.f32.xlu0 %v1191_v46 }
 0x2fd   : > { %1189 = vadd.xlane.f32.xlu1 %v1188_v56 }
 0x2ff   : > { %v2857_v38 = vpop.xlane.xlu0 %867 }
 0x300   : > { %1216 = vadd.xlane.f32.xlu0 %v1215_v54 }
 0x301   : > { %1213 = vadd.xlane.f32.xlu1 %v1212_v42 }
 0x303   : > { %v1146_v48 = vpop.permute.xlu0 %1145 }
 0x304   : > { %1195 = vadd.xlane.f32.xlu0 %v1194_v49  ;;  %v1197_v51 = vsel %vm400_vm0, %v1146_v48, 0.0 }
 0x305   : > { %1219 = vadd.xlane.f32.xlu1 %v1218_v55 }
 0x307   : > { %v1162_v28 = vpop.permute.xlu0 %1161 }
 0x308   : > { %v2864_v52 = vpop.xlane.xlu1 %891  ;;  %1198 = vadd.xlane.f32.xlu0 %v1197_v51  ;;  %v1221_v53 = vsel %vm400_vm0, %v1162_v28, 0.0 }
 0x30c   : > { %v1148_v57 = vpop.permute.xlu1 %1147  ;;  %1222 = vadd.xlane.f32.xlu0 %v1221_v53 }
 0x30d   : > { %v1200_v59 = vsel %vm400_vm0, %v1148_v57, 0.0 }
 0x30e   : > { %1201 = vadd.xlane.f32.xlu1 %v1200_v59 }
 0x310   : > { %v1164_v60 = vpop.permute.xlu1 %1163 }
 0x311   : > { %v1224_v61 = vsel %vm400_vm0, %v1164_v60, 0.0 }
 0x312   : > { %1225 = vadd.xlane.f32.xlu1 %v1224_v61 }
 0x338   : > { %v2869_v10 = vpop.xlane.xlu0 %870 }
 0x33c   : > { %v2871_v50 = vpop.xlane.xlu0 %894 }
 0x340   : > { %v1150_v36 = vpop.permute.xlu0 %1149 }
 0x341   : > { %v2873_v58 = vpop.xlane.xlu1 %873  ;;  %v1203_v3 = vsel %vm400_vm0, %v1150_v36, 0.0 }
 0x342   : > { %1204 = vadd.xlane.f32.xlu0 %v1203_v3 }
 0x344   : > { %v1166_v33 = vpop.permute.xlu0 %1165 }
 0x345   : > { %v2876_v5 = vpop.xlane.xlu1 %897  ;;  %v1227_v6 = vsel %vm400_vm0, %v1166_v33, 0.0 }
 0x346   : > { %1228 = vadd.xlane.f32.xlu0 %v1227_v6 }
 0x349   : > { %v1152_v7 = vpop.permute.xlu1 %1151 }
 0x34a   : > { %v1206_v11 = vsel %vm400_vm0, %v1152_v7, 0.0 }
 0x34b   : > { %1207 = vadd.xlane.f32.xlu1 %v1206_v11 }
 0x34d   : > { %v1168_v8 = vpop.permute.xlu1 %1167 }
 0x34e   : > { %v1230_v23 = vsel %vm400_vm0, %v1168_v8, 0.0 }
 0x34f   : > { %1231 = vadd.xlane.f32.xlu1 %v1230_v23 }
 0x375   : > { %v2881_v9 = vpop.xlane.xlu0 %876 }
 0x379   : > { %v2883_v17 = vpop.xlane.xlu0 %900 }
 0x37d   : > { %v1187_v37 = vpop.xlane.xlu0 %1186 }
 0x37e   : > { %v1233_v18 = vmul.f32 0.015625, %v1187_v37  ;;  %v2885_v22 = vpop.xlane.xlu1 %879 }
 0x380   : > { %v2888_v16 = vsub.f32 %v2664_v20, %v1233_v18 }
 0x381   : > { %v1211_v27 = vpop.xlane.xlu0 %1210 }
 0x382   : > { %v1241_v30 = vmul.f32 0.015625, %v1211_v27  ;;  %v2890_v31 = vpop.xlane.xlu1 %903  ;;  %v1265_v32 = vmul.f32 %v2888_v16, %v2888_v16 }
 0x384   : > { %v2895_v46 = vsub.f32 %v2679_v41, %v1241_v30  ;;  %1297 = vrot.lane.b32.xlu0 %v1265_v32, %s2311_s21 }
 0x385   : > { %v1193_v56 = vpop.xlane.xlu0 %1192 }
 0x386   : > { %v1190_v54 = vpop.xlane.xlu1 %1189  ;;  %v1273_v42 = vmul.f32 %v2895_v46, %v2895_v46  ;;  %v1235_v28 = vmul.f32 0.015625, %v1193_v56 }
 0x387   : > { %v1234_v43 = vmul.f32 0.015625, %v1190_v54 }
 0x388   : > { %1313 = vrot.lane.b32.xlu0 %v1273_v42, %s2311_s21  ;;  %v2916_v3 = vsub.f32 %v2785_v63, %v1235_v28 }
 0x389   : > { %v2902_v48 = vsub.f32 %v2676_v39, %v1234_v43  ;;  %v1217_v49 = vpop.xlane.xlu0 %1216 }
 0x38a   : > { %v1243_v55 = vmul.f32 0.015625, %v1217_v49  ;;  %v1214_v51 = vpop.xlane.xlu1 %1213  ;;  %v1267_v18 = vmul.f32 %v2916_v3, %v2916_v3 }
 0x38b   : > { %v1242_v53 = vmul.f32 0.015625, %v1214_v51  ;;  %v1266_v57 = vmul.f32 %v2902_v48, %v2902_v48 }
 0x38c   : > { %v2907_v59 = vsub.f32 %v2779_v62, %v1243_v55 }
 0x38d   : > { %v2910_v60 = vsub.f32 %v2692_v29, %v1242_v53  ;;  %1299 = vrot.lane.b32.xlu1 %v1266_v57, %s2311_s21  ;;  %v1196_v61 = vpop.xlane.xlu0 %1195 }
 0x38e   : > { %v1275_v36 = vmul.f32 %v2907_v59, %v2907_v59  ;;  %v1236_v33 = vmul.f32 0.015625, %v1196_v61  ;;  %v1220_v7 = vpop.xlane.xlu1 %1219 }
 0x38f   : > { %v1274_v6 = vmul.f32 %v2910_v60, %v2910_v60  ;;  %v1244_v37 = vmul.f32 0.015625, %v1220_v7 }
 0x390   : > { %1317 = vrot.lane.b32.xlu0 %v1275_v36, %s2311_s21  ;;  %v2923_v23 = vsub.f32 %v2791_v2, %v1236_v33 }
 0x391   : > { %1315 = vrot.lane.b32.xlu1 %v1274_v6, %s2311_s21  ;;  %v1199_v11 = vpop.xlane.xlu0 %1198  ;;  %v2934_v54 = vsub.f32 %v2797_v1, %v1244_v37 }
 0x392   : > { %v1237_v8 = vmul.f32 0.015625, %v1199_v11  ;;  %v1268_v43 = vmul.f32 %v2923_v23, %v2923_v23 }
 0x393   : > { %v1276_v57 = vmul.f32 %v2934_v54, %v2934_v54 }
 0x394   : > { %v2928_v27 = vsub.f32 %v2713_v4, %v1237_v8 }
 0x395   : > { %1301 = vrot.lane.b32.xlu1 %v1267_v18, %s2311_s21  ;;  %v1223_v30 = vpop.xlane.xlu0 %1222 }
 0x396   : > { %v1245_v32 = vmul.f32 0.015625, %v1223_v30  ;;  %v1269_v56 = vmul.f32 %v2928_v27, %v2928_v27 }
 0x397   : > { %v1202_v42 = vpop.xlane.xlu1 %1201 }
 0x398   : > { %v2939_v49 = vsub.f32 %v2727_v14, %v1245_v32  ;;  %v1238_v55 = vmul.f32 0.015625, %v1202_v42  ;;  %1305 = vrot.lane.b32.xlu0 %v1269_v56, %s2311_s21 }
 0x399   : > { %1303 = vrot.lane.b32.xlu1 %v1268_v43, %s2311_s21 }
 0x39a   : > { %v1277_v51 = vmul.f32 %v2939_v49, %v2939_v49  ;;  %v2946_v28 = vsub.f32 %v2724_v13, %v1238_v55 }
 0x39b   : > { %v1226_v53 = vpop.xlane.xlu1 %1225 }
 0x39c   : > { %v1246_v61 = vmul.f32 0.015625, %v1226_v53  ;;  %1321 = vrot.lane.b32.xlu0 %v1277_v51, %s2311_s21  ;;  %v1270_v33 = vmul.f32 %v2946_v28, %v2946_v28 }
 0x39d   : > { %1319 = vrot.lane.b32.xlu1 %v1276_v57, %s2311_s21 }
 0x39e   : > { %v2953_v36 = vsub.f32 %v2739_v47, %v1246_v61 }
 0x3a0   : > { %v1278_v6 = vmul.f32 %v2953_v36, %v2953_v36 }
 0x3a1   : > { %1307 = vrot.lane.b32.xlu1 %v1270_v33, %s2311_s21 }
 0x3a5   : > { %1323 = vrot.lane.b32.xlu1 %v1278_v6, %s2311_s21 }
 0x3cb   : > { %v1205_v7 = vpop.xlane.xlu0 %1204 }
 0x3cc   : > { %v1239_v11 = vmul.f32 0.015625, %v1205_v7 }
 0x3ce   : > { %v2962_v8 = vsub.f32 %v2736_v26, %v1239_v11 }
 0x3cf   : > { %v1229_v37 = vpop.xlane.xlu0 %1228 }
 0x3d0   : > { %v1247_v18 = vmul.f32 0.015625, %v1229_v37  ;;  %v1271_v30 = vmul.f32 %v2962_v8, %v2962_v8 }
 0x3d2   : > { %v2967_v32 = vsub.f32 %v2751_v40, %v1247_v18  ;;  %1309 = vrot.lane.b32.xlu0 %v1271_v30, %s2311_s21 }
 0x3d4   : > { %v1208_v56 = vpop.xlane.xlu1 %1207  ;;  %v1279_v42 = vmul.f32 %v2967_v32, %v2967_v32 }
 0x3d5   : > { %v1240_v43 = vmul.f32 0.015625, %v1208_v56 }
 0x3d6   : > { %1325 = vrot.lane.b32.xlu0 %v1279_v42, %s2311_s21 }
 0x3d7   : > { %v2974_v55 = vsub.f32 %v2748_v45, %v1240_v43 }
 0x3d8   : > { %v1232_v51 = vpop.xlane.xlu1 %1231 }
 0x3d9   : > { %v1248_v53 = vmul.f32 0.015625, %v1232_v51  ;;  %v1272_v57 = vmul.f32 %v2974_v55, %v2974_v55 }
 0x3db   : > { %v2979_v61 = vsub.f32 %v2760_v0, %v1248_v53  ;;  %1311 = vrot.lane.b32.xlu1 %v1272_v57, %s2311_s21 }
 0x3dd   : > { %v1280_v33 = vmul.f32 %v2979_v61, %v2979_v61 }
 0x3df   : > { %1327 = vrot.lane.b32.xlu1 %v1280_v33, %s2311_s21 }
 0x3f6   : > { %v1298_v6 = vpop.permute.xlu0 %1297 }
 0x3f7   : > { %v1345_v7 = vsel %vm400_vm0, %v1298_v6, 0.0 }
 0x3f8   : > { %1346 = vadd.xlane.f32.xlu0 %v1345_v7 }
 0x3fa   : > { %v1314_v11 = vpop.permute.xlu0 %1313 }
 0x3fb   : > { %v1369_v37 = vsel %vm400_vm0, %v1314_v11, 0.0 }
 0x3fc   : > { %1370 = vadd.xlane.f32.xlu0 %v1369_v37 }
 0x3ff   : > { %v1300_v18 = vpop.permute.xlu1 %1299 }
 0x400   : > { %v1348_v30 = vsel %vm400_vm0, %v1300_v18, 0.0 }
 0x402   : > { %v1318_v43 = vpop.permute.xlu0 %1317 }
 0x403   : > { %v1316_v56 = vpop.permute.xlu1 %1315  ;;  %1349 = vadd.xlane.f32.xlu1 %v1348_v30  ;;  %v1375_v6 = vsel %vm400_vm0, %v1318_v43, 0.0 }
 0x404   : > { %v1372_v42 = vsel %vm400_vm0, %v1316_v56, 0.0 }
 0x407   : > { %v1302_v51 = vpop.permute.xlu1 %1301  ;;  %1373 = vadd.xlane.f32.xlu1 %v1372_v42 }
 0x408   : > { %v1351_v53 = vsel %vm400_vm0, %v1302_v51, 0.0 }
 0x409   : > { %1352 = vadd.xlane.f32.xlu0 %v1351_v53 }
 0x40a   : > { %v1306_v57 = vpop.permute.xlu0 %1305 }
 0x40b   : > { %v1304_v33 = vpop.permute.xlu1 %1303  ;;  %v1357_v37 = vsel %vm400_vm0, %v1306_v57, 0.0  ;;  %v3001_v57 = vld [vmem:[%s3343_s4] sm:$0xf] }
 0x40c   : > { %v1354_v7 = vsel %vm400_vm0, %v1304_v33, 0.0  ;;  %v1483_v33 = vsub.s32 3, %v2575_v19 }
 0x40d   : > { %1355 = vadd.xlane.f32.xlu1 %v1354_v7  ;;  %1376 = vadd.xlane.f32.xlu0 %v1375_v6  ;;  %v905_v7 = vmul.f32 0.015625, %v2833_v12 }
 0x40e   : > { %v1322_v30 = vpop.permute.xlu0 %1321  ;;  %v1484_v6 = vrot.slane %v3001_v57, %v1483_v33 }
 0x40f   : > { %v1320_v11 = vpop.permute.xlu1 %1319  ;;  %v1381_v42 = vsel %vm400_vm0, %v1322_v30, 0.0 }
 0x410   : > { %v1378_v18 = vsel %vm400_vm0, %v1320_v11, 0.0 }
 0x411   : > { %1379 = vadd.xlane.f32.xlu1 %v1378_v18  ;;  %1358 = vadd.xlane.f32.xlu0 %v1357_v37  ;;  %v3007_v37 = vsub.f32 %v2664_v20, %v905_v7  ;;  %v910_v20 = vmul.f32 0.015625, %v2873_v58 }
 0x413   : > { %v1308_v56 = vpop.permute.xlu1 %1307  ;;  %v3021_v7 = vsub.f32 %v2724_v13, %v910_v20  ;;  %v920_v20 = vmul.f32 0.015625, %v2890_v31 }
 0x414   : > { %v1360_v51 = vsel %vm400_vm0, %v1308_v56, 0.0 }
 0x415   : > { %1361 = vadd.xlane.f32.xlu1 %v1360_v51  ;;  %1382 = vadd.xlane.f32.xlu0 %v1381_v42  ;;  %v937_v42 = vmul.f32 %v3007_v37, %v3007_v37  ;;  %v908_v51 = vmul.f32 0.015625, %v2857_v38  ;;  %v942_v13 = vmul.f32 %v3021_v7, %v3021_v7 }
 0x417   : > { %v1324_v43 = vpop.permute.xlu1 %1323  ;;  %v3016_v12 = vsub.f32 %v2791_v2, %v908_v51  ;;  %v1459_v2 = vsub.s32 2, %v2575_v19  ;;  %v916_v51 = vmul.f32 0.015625, %v2864_v52  ;;  %v968_v19 = vsel %vm400_vm0, %v942_v13, 0.0 }
 0x418   : > { %v1384_v53 = vsel %vm400_vm0, %v1324_v43, 0.0 }
 0x419   : > { %1385 = vadd.xlane.f32.xlu1 %v1384_v53  ;;  %v953_v53 = vsel %vm400_vm0, %v937_v42, 0.0 }
 0x42a   : > { %1486 = vrot.lane.b32.xlu1 %v1484_v6, %s2311_s21 }
 0x444   : > { %v1310_v11 = vpop.permute.xlu0 %1309 }
 0x445   : > { %v1363_v18 = vsel %vm400_vm0, %v1310_v11, 0.0  ;;  %v912_v11 = vmul.f32 0.015625, %v2885_v22  ;;  %v1460_v22 = vrot.slane %v3001_v57, %v1459_v2  ;;  %v907_v2 = vmul.f32 0.015625, %v2848_v21 }
 0x446   : > { %1364 = vadd.xlane.f32.xlu0 %v1363_v18  ;;  %v940_v18 = vmul.f32 %v3016_v12, %v3016_v12  ;;  %v913_v21 = vmul.f32 0.015625, %v2839_v35  ;;  %v917_v35 = vmul.f32 0.015625, %v2871_v50 }
 0x447   : > { %v3030_v58 = vsub.f32 %v2748_v45, %v912_v11  ;;  %v3045_v45 = vsub.f32 %v2797_v1, %v916_v51  ;;  %v3059_v1 = vsub.f32 %v2760_v0, %v920_v20  ;;  %v911_v51 = vmul.f32 0.015625, %v2881_v9 }
 0x448   : > { %v1326_v30 = vpop.permute.xlu0 %1325  ;;  %v915_v9 = vmul.f32 0.015625, %v2853_v25  ;;  %v919_v25 = vmul.f32 0.015625, %v2883_v17 }
 0x449   : > { %v1387_v56 = vsel %vm400_vm0, %v1326_v30, 0.0  ;;  %v914_v30 = vmul.f32 0.015625, %v2841_v15  ;;  %v944_v15 = vmul.f32 %v3030_v58, %v3030_v58  ;;  %v952_v31 = vmul.f32 %v3059_v1, %v3059_v1 }
 0x44a   : > { %1388 = vadd.xlane.f32.xlu0 %v1387_v56  ;;  %v962_v56 = vsel %vm400_vm0, %v940_v18, 0.0  ;;  %v906_v18 = vmul.f32 0.015625, %v2835_v44 }
 0x44b   : > { %v3037_v42 = vsub.f32 %v2692_v29, %v914_v30  ;;  %v3074_v30 = vsub.f32 %v2785_v63, %v907_v2  ;;  %v3088_v63 = vsub.f32 %v2736_v26, %v911_v51  ;;  %v3101_v26 = vsub.f32 %v2779_v62, %v915_v9 }
 0x44c   : > { %v3070_v0 = vsub.f32 %v2676_v39, %v906_v18  ;;  %v3115_v62 = vsub.f32 %v2751_v40, %v919_v25 }
 0x44d   : > { %v1312_v43 = vpop.permute.xlu1 %1311  ;;  %v946_v29 = vmul.f32 %v3037_v42, %v3037_v42  ;;  %v939_v39 = vmul.f32 %v3074_v30, %v3074_v30 }
 0x44e   : > { %954 = vadd.xlane.f32.xlu1 %v953_v53  ;;  %v1366_v33 = vsel %vm400_vm0, %v1312_v43, 0.0  ;;  %v918_v43 = vmul.f32 0.015625, %v2876_v5  ;;  %v974_v53 = vsel %vm400_vm0, %v944_v15, 0.0  ;;  %v938_v13 = vmul.f32 %v3070_v0, %v3070_v0 }
 0x44f   : > { %v951_v17 = vmul.f32 %v3115_v62, %v3115_v62 }
 0x450   : > { %v3052_v52 = vsub.f32 %v2739_v47, %v918_v43  ;;  %v956_v44 = vsel %vm400_vm0, %v938_v13, 0.0  ;;  %v943_v43 = vmul.f32 %v3088_v63, %v3088_v63 }
 0x451   : > { %v1328_v6 = vpop.permute.xlu1 %1327 }
 0x452   : > { %1367 = vadd.xlane.f32.xlu1 %v1366_v33  ;;  %v1390_v38 = vsel %vm400_vm0, %v1328_v6, 0.0  ;;  %v980_v33 = vsel %vm400_vm0, %v946_v29, 0.0  ;;  %v948_v6 = vmul.f32 %v3045_v45, %v3045_v45  ;;  %v950_v11 = vmul.f32 %v3052_v52, %v3052_v52 }
 0x454   : > { %v986_v5 = vsel %vm400_vm0, %v948_v6, 0.0  ;;  %v992_v47 = vsel %vm400_vm0, %v950_v11, 0.0 }
 0x456   : > { %1391 = vadd.xlane.f32.xlu1 %v1390_v38  ;;  %v998_v38 = vsel %vm400_vm0, %v952_v31, 0.0 }
 0x45a   : > { %963 = vadd.xlane.f32.xlu1 %v962_v56  ;;  %v909_v56 = vmul.f32 0.015625, %v2869_v10  ;;  %v959_v10 = vsel %vm400_vm0, %v939_v39, 0.0 }
 0x45e   : > { %969 = vadd.xlane.f32.xlu1 %v968_v19 }
 0x460   : > { %1462 = vrot.lane.b32.xlu0 %v1460_v22, %s2311_s21  ;;  %v3080_v22 = vsub.f32 %v2713_v4, %v909_v56  ;;  %v3094_v4 = vsub.f32 %v2679_v41, %v913_v21  ;;  %v3108_v41 = vsub.f32 %v2727_v14, %v917_v35 }
 0x462   : > { %975 = vadd.xlane.f32.xlu1 %v974_v53  ;;  %v941_v19 = vmul.f32 %v3080_v22, %v3080_v22  ;;  %v971_v53 = vsel %vm400_vm0, %v943_v43, 0.0  ;;  %v945_v29 = vmul.f32 %v3094_v4, %v3094_v4  ;;  %v949_v6 = vmul.f32 %v3108_v41, %v3108_v41 }
 0x464   : > { %v965_v15 = vsel %vm400_vm0, %v941_v19, 0.0  ;;  %v977_v20 = vsel %vm400_vm0, %v945_v29, 0.0  ;;  %v989_v14 = vsel %vm400_vm0, %v949_v6, 0.0 }
 0x466   : > { %981 = vadd.xlane.f32.xlu1 %v980_v33  ;;  %v947_v33 = vmul.f32 %v3101_v26, %v3101_v26 }
 0x468   : > { %v983_v50 = vsel %vm400_vm0, %v947_v33, 0.0 }
 0x46a   : > { %987 = vadd.xlane.f32.xlu1 %v986_v5  ;;  %v995_v5 = vsel %vm400_vm0, %v951_v17, 0.0 }
 0x46e   : > { %993 = vadd.xlane.f32.xlu1 %v992_v47 }
 0x472   : > { %999 = vadd.xlane.f32.xlu1 %v998_v38 }
 0x47f   : > { %957 = vadd.xlane.f32.xlu0 %v956_v44 }
 0x481   : > { %v1347_v11 = vpop.xlane.xlu0 %1346 }
 0x482   : > { %v1393_v2 = vmul.f32 0.015625, %v1347_v11 }
 0x483   : > { %960 = vadd.xlane.f32.xlu0 %v959_v10 }
 0x484   : > { %v1409_v39 = vadd.f32 1e-06, %v1393_v2 }
 0x485   : > { %v1371_v31 = vpop.xlane.xlu0 %1370 }
 0x486   : > { %v1401_v13 = vmul.f32 0.015625, %v1371_v31  ;;  %2206 = vrsqrt.f32 %v1409_v39 }
 0x487   : > { %966 = vadd.xlane.f32.xlu0 %v965_v15 }
 0x488   : > { %v1417_v19 = vadd.f32 1e-06, %v1401_v13 }
 0x48a   : > { %2208 = vrsqrt.f32 %v1417_v19 }
 0x48b   : > { %972 = vadd.xlane.f32.xlu0 %v971_v53 }
 0x48c   : > { %v1350_v47 = vpop.xlane.xlu1 %1349 }
 0x48d   : > { %v1394_v51 = vmul.f32 0.015625, %v1350_v47 }
 0x48f   : > { %978 = vadd.xlane.f32.xlu0 %v977_v20  ;;  %v1410_v9 = vadd.f32 1e-06, %v1394_v51 }
 0x490   : > { %v1374_v40 = vpop.xlane.xlu1 %1373 }
 0x491   : > { %v1402_v44 = vmul.f32 0.015625, %v1374_v40  ;;  %2210 = vrsqrt.f32 %v1410_v9 }
 0x492   : > { %v1353_v38 = vpop.xlane.xlu0 %1352 }
 0x493   : > { %984 = vadd.xlane.f32.xlu0 %v983_v50  ;;  %v1395_v21 = vmul.f32 0.015625, %v1353_v38  ;;  %v1418_v35 = vadd.f32 1e-06, %v1402_v44 }
 0x495   : > { %v1411_v53 = vadd.f32 1e-06, %v1395_v21  ;;  %2212 = vrsqrt.f32 %v1418_v35 }
 0x496   : > { %v1356_v18 = vpop.xlane.xlu1 %1355  ;;  %v1377_v56 = vpop.xlane.xlu0 %1376 }
 0x497   : > { %990 = vadd.xlane.f32.xlu0 %v989_v14  ;;  %v1403_v15 = vmul.f32 0.015625, %v1377_v56  ;;  %v1396_v29 = vmul.f32 0.015625, %v1356_v18  ;;  %2214 = vrsqrt.f32 %v1411_v53  ;;  %v2207_v56 = vpop.eup %2206 }
 0x498   : > { %v2209_v51 = vpop.eup %2208 }
 0x499   : > { %v1419_v25 = vadd.f32 1e-06, %v1403_v15  ;;  %v1412_v14 = vadd.f32 1e-06, %v1396_v29 }
 0x49a   : > { %v1380_v10 = vpop.xlane.xlu1 %1379  ;;  %v1359_v43 = vpop.xlane.xlu0 %1358 }
 0x49b   : > { %996 = vadd.xlane.f32.xlu0 %v995_v5  ;;  %v1397_v33 = vmul.f32 0.015625, %v1359_v43  ;;  %v1404_v6 = vmul.f32 0.015625, %v1380_v10  ;;  %2216 = vrsqrt.f32 %v1419_v25  ;;  %v1441_v25 = vmul.f32 %v2207_v56, %v2888_v16 }
 0x49c   : > { %2218 = vrsqrt.f32 %v1412_v14 }
 0x49d   : > { %v1413_v5 = vadd.f32 1e-06, %v1397_v33  ;;  %v1420_v31 = vadd.f32 1e-06, %v1404_v6  ;;  %v1449_v6 = vmul.f32 %v2209_v51, %v2895_v46 }
 0x49e   : > { %v1362_v20 = vpop.xlane.xlu1 %1361  ;;  %v1383_v50 = vpop.xlane.xlu0 %1382 }
 0x49f   : > { %v1398_v17 = vmul.f32 0.015625, %v1362_v20  ;;  %v1405_v11 = vmul.f32 0.015625, %v1383_v50  ;;  %2220 = vrsqrt.f32 %v1413_v5  ;;  %v2211_v44 = vpop.eup %2210 }
 0x4a0   : > { %2222 = vrsqrt.f32 %v1420_v31  ;;  %v1442_v29 = vmul.f32 %v2211_v44, %v2902_v48 }
 0x4a1   : > { %v1414_v40 = vadd.f32 1e-06, %v1398_v17  ;;  %v1421_v38 = vadd.f32 1e-06, %v1405_v11 }
 0x4a2   : > { %v1386_v47 = vpop.xlane.xlu1 %1385  ;;  %v2213_v10 = vpop.eup %2212 }
 0x4a3   : > { %v1406_v2 = vmul.f32 0.015625, %v1386_v47  ;;  %2224 = vrsqrt.f32 %v1414_v40  ;;  %v1450_v50 = vmul.f32 %v2213_v10, %v2910_v60 }
 0x4a4   : > { %2226 = vrsqrt.f32 %v1421_v38  ;;  %v2215_v15 = vpop.eup %2214 }
 0x4a5   : > { %v1422_v39 = vadd.f32 1e-06, %v1406_v2  ;;  %v1443_v14 = vmul.f32 %v2215_v15, %v2916_v3 }
 0x4a6   : > { %v3124_v19 = vpop.permute.xlu1 %1486 }
 0x4a8   : > { %v2217_v35 = vpop.eup %2216 }
 0x4a9   : > { %v1451_v16 = vmul.f32 %v2217_v35, %v2907_v59  ;;  %v2219_v31 = vpop.eup %2218 }
 0x4ac   : > { %v2221_v38 = vpop.eup %2220 }
 0x4cf   : > { %v1365_v18 = vpop.xlane.xlu0 %1364 }
 0x4d0   : > { %v1399_v13 = vmul.f32 0.015625, %v1365_v18 }
 0x4d2   : > { %v1415_v21 = vadd.f32 1e-06, %v1399_v13 }
 0x4d3   : > { %v1389_v9 = vpop.xlane.xlu0 %1388 }
 0x4d4   : > { %2228 = vrsqrt.f32 %v1415_v21  ;;  %v1407_v43 = vmul.f32 0.015625, %v1389_v9  ;;  %v1444_v21 = vmul.f32 %v2219_v31, %v2923_v23 }
 0x4d5   : > { %2230 = vrsqrt.f32 %v1422_v39  ;;  %v2223_v39 = vpop.eup %2222 }
 0x4d6   : > { %v1423_v53 = vadd.f32 1e-06, %v1407_v43  ;;  %v2225_v10 = vpop.eup %2224  ;;  %v1445_v43 = vmul.f32 %v2221_v38, %v2928_v27 }
 0x4d7   : > { %v955_v20 = vpop.xlane.xlu1 %954  ;;  %v3128_v33 = vpop.permute.xlu0 %1462 }
 0x4d8   : > { %2232 = vrsqrt.f32 %v1423_v53  ;;  %v1001_v17 = vmul.f32 0.015625, %v955_v20  ;;  %v1466_v5 = vmul.f32 %v3128_v33, %v1442_v29  ;;  %v1465_v11 = vmul.f32 %v3128_v33, %v1441_v25  ;;  %v2227_v35 = vpop.eup %2226 }
 0x4d9   : > { %v1474_v47 = vmul.f32 %v3128_v33, %v1450_v50  ;;  %v1473_v48 = vmul.f32 %v3128_v33, %v1449_v6  ;;  %v1467_v3 = vmul.f32 %v3128_v33, %v1443_v14  ;;  %v1475_v13 = vmul.f32 %v3128_v33, %v1451_v16 }
 0x4da   : > { %v1017_v40 = vadd.f32 1e-06, %v1001_v17  ;;  %v1490_v60 = vadd.f32 %v3124_v19, %v1466_v5  ;;  %v1489_v46 = vadd.f32 %v3124_v19, %v1465_v11  ;;  %v1468_v20 = vmul.f32 %v3128_v33, %v1444_v21 }
 0x4db   : > { %v1368_v2 = vpop.xlane.xlu1 %1367  ;;  %v1498_v18 = vadd.f32 %v3124_v19, %v1474_v47  ;;  %v1497_v56 = vadd.f32 %v3124_v19, %v1473_v48  ;;  %v1491_v15 = vadd.f32 %v3124_v19, %v1467_v3  ;;  %v1499_v25 = vadd.f32 %v3124_v19, %v1475_v13 }
 0x4dc   : > { %2234 = vrsqrt.f32 %v1017_v40  ;;  %v1400_v51 = vmul.f32 0.015625, %v1368_v2  ;;  %v2081_v44 = vpack.c.bf16 %v1490_v60, %v1490_v60  ;;  %v2080_v59 = vpack.c.bf16 %v1489_v46, %v1489_v46 }
 0x4dd   : > { %v2089_v29 = vpack.c.bf16 %v1498_v18, %v1498_v18  ;;  %v2088_v23 = vpack.c.bf16 %v1497_v56, %v1497_v56  ;;  %v1469_v6 = vmul.f32 %v3128_v33, %v1445_v43  ;;  %v1452_v17 = vmul.f32 %v2223_v39, %v2934_v54 }
 0x4de   : > { %v1416_v9 = vadd.f32 1e-06, %v1400_v51  ;;  %1636 = vrot.lane.b32.xlu1 %v2081_v44, %s2311_s21  ;;  %1634 = vrot.lane.b32.xlu0 %v2080_v59, %s2311_s21  ;;  %v2082_v27 = vpack.c.bf16 %v1491_v15, %v1491_v15  ;;  %v1453_v11 = vmul.f32 %v2227_v35, %v2939_v49  ;;  %v1446_v47 = vmul.f32 %v2225_v10, %v2946_v28 }
 0x4df   : > { %v1392_v53 = vpop.xlane.xlu1 %1391  ;;  %v2090_v31 = vpack.c.bf16 %v1499_v25, %v1499_v25  ;;  %v1492_v40 = vadd.f32 %v3124_v19, %v1468_v20  ;;  %v1476_v60 = vmul.f32 %v3128_v33, %v1452_v17  ;;  %v1493_v3 = vadd.f32 %v3124_v19, %v1469_v6 }
 0x4e0   : > { %2236 = vrsqrt.f32 %v1416_v9  ;;  %v1408_v50 = vmul.f32 0.015625, %v1392_v53  ;;  %v1477_v38 = vmul.f32 %v3128_v33, %v1453_v11  ;;  %v3164_v49 = vrot.slane %v3001_v57, %v2584_v24 }
 0x4e1   : > { %v2229_v14 = vpop.eup %2228  ;;  %v1470_v18 = vmul.f32 %v3128_v33, %v1446_v47  ;;  %v2083_v13 = vpack.c.bf16 %v1492_v40, %v1492_v40  ;;  %v1500_v51 = vadd.f32 %v3124_v19, %v1476_v60  ;;  %v2084_v39 = vpack.c.bf16 %v1493_v3, %v1493_v3 }
 0x4e2   : > { %v1424_v5 = vadd.f32 1e-06, %v1408_v50  ;;  %1652 = vrot.lane.b32.xlu1 %v2089_v29, %s2311_s21  ;;  %1650 = vrot.lane.b32.xlu0 %v2088_v23, %s2311_s21  ;;  %v2231_v48 = vpop.eup %2230  ;;  %v1447_v46 = vmul.f32 %v2229_v14, %v2962_v8  ;;  %v1501_v21 = vadd.f32 %v3124_v19, %v1477_v38  ;;  %v3176_v9 = vrot.slane %v3001_v57, %v2578_v34 }
 0x4e3   : > { %v964_v16 = vpop.xlane.xlu1 %963  ;;  %v1454_v8 = vmul.f32 %v2231_v48, %v2953_v36  ;;  %v2091_v35 = vpack.c.bf16 %v1500_v51, %v1500_v51  ;;  %v1494_v53 = vadd.f32 %v3124_v19, %v1470_v18 }
 0x4e4   : > { %2238 = vrsqrt.f32 %v1424_v5  ;;  %v1004_v54 = vmul.f32 0.015625, %v964_v16  ;;  %v1471_v44 = vmul.f32 %v3128_v33, %v1447_v46 }
 0x4e5   : > { %v2233_v2 = vpop.eup %2232  ;;  %v1478_v43 = vmul.f32 %v3128_v33, %v1454_v8  ;;  %v2085_v17 = vpack.c.bf16 %v1494_v53, %v1494_v53 }
 0x4e6   : > { %v1020_v28 = vadd.f32 1e-06, %v1004_v54  ;;  %1638 = vrot.lane.b32.xlu1 %v2082_v27, %s2311_s21  ;;  %1654 = vrot.lane.b32.xlu0 %v2090_v31, %s2311_s21  ;;  %v1455_v59 = vmul.f32 %v2233_v2, %v2967_v32  ;;  %v1495_v29 = vadd.f32 %v3124_v19, %v1471_v44 }
 0x4e7   : > { %v970_v56 = vpop.xlane.xlu1 %969  ;;  %v1502_v27 = vadd.f32 %v3124_v19, %v1478_v43 }
 0x4e8   : > { %2240 = vrsqrt.f32 %v1020_v28  ;;  %v1006_v24 = vmul.f32 0.015625, %v970_v56  ;;  %v1479_v25 = vmul.f32 %v3128_v33, %v1455_v59  ;;  %v2086_v5 = vpack.c.bf16 %v1495_v29, %v1495_v29 }
 0x4e9   : > { %v2235_v10 = vpop.eup %2234  ;;  %v2093_v54 = vpack.c.bf16 %v1502_v27, %v1502_v27 }
 0x4ea   : > { %v1049_v36 = vmul.f32 %v2235_v10, %v3007_v37  ;;  %v1022_v15 = vadd.f32 1e-06, %v1006_v24  ;;  %1640 = vrot.lane.b32.xlu1 %v2083_v13, %s2311_s21  ;;  %1642 = vrot.lane.b32.xlu0 %v2084_v39, %s2311_s21  ;;  %v2092_v37 = vpack.c.bf16 %v1501_v21, %v1501_v21  ;;  %v1503_v11 = vadd.f32 %v3124_v19, %v1479_v25 }
 0x4eb   : > { %v976_v32 = vpop.xlane.xlu1 %975 }
 0x4ec   : > { %v1069_v34 = vmul.f32 %v3164_v49, %v1049_v36  ;;  %2242 = vrsqrt.f32 %v1022_v15  ;;  %v1008_v57 = vmul.f32 0.015625, %v976_v32  ;;  %v2094_v3 = vpack.c.bf16 %v1503_v11, %v1503_v11 }
 0x4ed   : > { %v2237_v20 = vpop.eup %2236 }
 0x4ee   : > { %v1089_v50 = vadd.f32 %v3176_v9, %v1069_v34  ;;  %v1024_v23 = vadd.f32 1e-06, %v1008_v57  ;;  %1656 = vrot.lane.b32.xlu1 %v2091_v35, %s2311_s21  ;;  %1658 = vrot.lane.b32.xlu0 %v2092_v37, %s2311_s21  ;;  %v1448_v6 = vmul.f32 %v2237_v20, %v2974_v55 }
 0x4ef   : > { %v982_v14 = vpop.xlane.xlu1 %981 }
 0x4f0   : > { %v1105_v47 = vmul.f32 0.25, %v1089_v50  ;;  %2244 = vrsqrt.f32 %v1024_v23  ;;  %v1010_v48 = vmul.f32 0.015625, %v982_v14  ;;  %v1472_v16 = vmul.f32 %v3128_v33, %v1448_v6 }
 0x4f1   : > { %v2239_v31 = vpop.eup %2238 }
 0x4f2   : > { %v2064_v55 = vpack.c.bf16 %v1105_v47, %v1105_v47  ;;  %v1026_v40 = vadd.f32 1e-06, %v1010_v48  ;;  %1644 = vrot.lane.b32.xlu1 %v2085_v17, %s2311_s21  ;;  %1646 = vrot.lane.b32.xlu0 %v2086_v5, %s2311_s21  ;;  %v1456_v60 = vmul.f32 %v2239_v31, %v2979_v61  ;;  %v1496_v2 = vadd.f32 %v3124_v19, %v1472_v16 }
 0x4f3   : > { %v988_v46 = vpop.xlane.xlu1 %987 }
 0x4f4   : > { %1570 = vst.msk [vmem:[%s3197_s12] sm:$0xf] %vm1569_vm1, %v2064_v55  ;;  %2246 = vrsqrt.f32 %v1026_v40  ;;  %v1012_v38 = vmul.f32 0.015625, %v988_v46  ;;  %v1480_v28 = vmul.f32 %v3128_v33, %v1456_v60  ;;  %v2087_v59 = vpack.c.bf16 %v1496_v2, %v1496_v2 }
 0x4f5   : > { %v2241_v18 = vpop.eup %2240 }
 0x4f6   : > { %v1052_v8 = vmul.f32 %v2241_v18, %v3016_v12  ;;  %v1028_v56 = vadd.f32 1e-06, %v1012_v38  ;;  %1660 = vrot.lane.b32.xlu1 %v2093_v54, %s2311_s21  ;;  %1662 = vrot.lane.b32.xlu0 %v2094_v3, %s2311_s21  ;;  %v1504_v13 = vadd.f32 %v3124_v19, %v1480_v28 }
 0x4f7   : > { %v994_v61 = vpop.xlane.xlu1 %993 }
 0x4f8   : > { %v1072_v51 = vmul.f32 %v3164_v49, %v1052_v8  ;;  %2248 = vrsqrt.f32 %v1028_v56  ;;  %v1014_v44 = vmul.f32 0.015625, %v994_v61  ;;  %v2095_v10 = vpack.c.bf16 %v1504_v13, %v1504_v13 }
 0x4f9   : > { %v2243_v24 = vpop.eup %2242 }
 0x4fa   : > { %v1092_v39 = vadd.f32 %v3176_v9, %v1072_v51  ;;  %v1054_v33 = vmul.f32 %v2243_v24, %v3021_v7  ;;  %v1030_v12 = vadd.f32 1e-06, %v1014_v44  ;;  %1648 = vrot.lane.b32.xlu1 %v2087_v59, %s2311_s21 }
 0x4fb   : > { %v1000_v21 = vpop.xlane.xlu1 %999 }
 0x4fc   : > { %v1108_v36 = vmul.f32 0.25, %v1092_v39  ;;  %v1074_v15 = vmul.f32 %v3164_v49, %v1054_v33  ;;  %2250 = vrsqrt.f32 %v1030_v12  ;;  %v1016_v19 = vmul.f32 0.015625, %v1000_v21 }
 0x4fd   : > { %v2245_v43 = vpop.eup %2244 }
 0x4fe   : > { %v2067_v32 = vpack.c.bf16 %v1108_v36, %v1108_v36  ;;  %v1094_v35 = vadd.f32 %v3176_v9, %v1074_v15  ;;  %v1056_v53 = vmul.f32 %v2245_v43, %v3030_v58  ;;  %v1032_v29 = vadd.f32 1e-06, %v1016_v19  ;;  %1664 = vrot.lane.b32.xlu1 %v2095_v10, %s2311_s21 }
 0x500   : > { %1573 = vst.msk [vmem:[%s3197_s12 + $0xc] sm:$0xf] %vm1569_vm1, %v2067_v32  ;;  %v1110_v7 = vmul.f32 0.25, %v1094_v35  ;;  %v1076_v25 = vmul.f32 %v3164_v49, %v1056_v53  ;;  %2252 = vrsqrt.f32 %v1032_v29 }
 0x501   : > { %v2247_v34 = vpop.eup %2246 }
 0x502   : > { %v2069_v57 = vpack.c.bf16 %v1110_v7, %v1110_v7  ;;  %v1096_v37 = vadd.f32 %v3176_v9, %v1076_v25  ;;  %v1058_v20 = vmul.f32 %v2247_v34, %v3037_v42 }
 0x504   : > { %1575 = vst.msk [vmem:[%s3197_s12 + $0x14] sm:$0xf] %vm1569_vm1, %v2069_v57  ;;  %v1112_v50 = vmul.f32 0.25, %v1096_v37  ;;  %v1078_v58 = vmul.f32 %v3164_v49, %v1058_v20 }
 0x505   : > { %v2249_v23 = vpop.eup %2248 }
 0x506   : > { %v2071_v6 = vpack.c.bf16 %v1112_v50, %v1112_v50  ;;  %v1098_v14 = vadd.f32 %v3176_v9, %v1078_v58  ;;  %v1060_v17 = vmul.f32 %v2249_v23, %v3045_v45 }
 0x508   : > { %1577 = vst.msk [vmem:[%s3197_s12 + $0x1c] sm:$0xf] %vm1569_vm1, %v2071_v6  ;;  %v1114_v5 = vmul.f32 0.25, %v1098_v14  ;;  %v1080_v27 = vmul.f32 %v3164_v49, %v1060_v17  ;;  %v958_v11 = vpop.xlane.xlu0 %957 }
 0x509   : > { %v2251_v47 = vpop.eup %2250  ;;  %v1002_v42 = vmul.f32 0.015625, %v958_v11 }
 0x50a   : > { %v2073_v48 = vpack.c.bf16 %v1114_v5, %v1114_v5  ;;  %v1100_v16 = vadd.f32 %v3176_v9, %v1080_v27  ;;  %v1062_v31 = vmul.f32 %v2251_v47, %v3052_v52 }
 0x50b   : > { %v1018_v55 = vadd.f32 1e-06, %v1002_v42 }
 0x50c   : > { %1579 = vst.msk [vmem:[%s3197_s12 + $0x24] sm:$0xf] %vm1569_vm1, %v2073_v48  ;;  %v1116_v40 = vmul.f32 0.25, %v1100_v16  ;;  %v1082_v45 = vmul.f32 %v3164_v49, %v1062_v31  ;;  %v961_v60 = vpop.xlane.xlu0 %960 }
 0x50d   : > { %v2253_v46 = vpop.eup %2252  ;;  %2254 = vrsqrt.f32 %v1018_v55  ;;  %v1003_v54 = vmul.f32 0.015625, %v961_v60 }
 0x50e   : > { %v2075_v3 = vpack.c.bf16 %v1116_v40, %v1116_v40  ;;  %v1102_v38 = vadd.f32 %v3176_v9, %v1082_v45  ;;  %v1064_v2 = vmul.f32 %v2253_v46, %v3059_v1 }
 0x50f   : > { %v1019_v28 = vadd.f32 1e-06, %v1003_v54 }
 0x510   : > { %1581 = vst.msk [vmem:[%s3197_s12 + $0x2c] sm:$0xf] %vm1569_vm1, %v2075_v3  ;;  %v1118_v52 = vmul.f32 0.25, %v1102_v38  ;;  %v1084_v18 = vmul.f32 %v3164_v49, %v1064_v2  ;;  %v967_v8 = vpop.xlane.xlu0 %966 }
 0x511   : > { %2256 = vrsqrt.f32 %v1019_v28  ;;  %v1005_v56 = vmul.f32 0.015625, %v967_v8 }
 0x512   : > { %v2077_v61 = vpack.c.bf16 %v1118_v52, %v1118_v52  ;;  %v1104_v13 = vadd.f32 %v3176_v9, %v1084_v18 }
 0x513   : > { %v1021_v51 = vadd.f32 1e-06, %v1005_v56 }
 0x514   : > { %1583 = vst.msk [vmem:[%s3197_s12 + $0x34] sm:$0xf] %vm1569_vm1, %v2077_v61  ;;  %v1120_v44 = vmul.f32 0.25, %v1104_v13  ;;  %v973_v59 = vpop.xlane.xlu0 %972 }
 0x515   : > { %2258 = vrsqrt.f32 %v1021_v51  ;;  %v1007_v1 = vmul.f32 0.015625, %v973_v59 }
 0x516   : > { %v2079_v24 = vpack.c.bf16 %v1120_v44, %v1120_v44 }
 0x517   : > { %v1023_v39 = vadd.f32 1e-06, %v1007_v1 }
 0x518   : > { %1585 = vst.msk [vmem:[%s3197_s12 + $0x3c] sm:$0xf] %vm1569_vm1, %v2079_v24  ;;  %v979_v33 = vpop.xlane.xlu0 %978 }
 0x519   : > { %2260 = vrsqrt.f32 %v1023_v39  ;;  %v1009_v12 = vmul.f32 0.015625, %v979_v33 }
 0x51a   : > { %v2255_v21 = vpop.eup %2254 }
 0x51b   : > { %v1050_v10 = vmul.f32 %v2255_v21, %v3070_v0  ;;  %v1025_v36 = vadd.f32 1e-06, %v1009_v12 }
 0x51c   : > { %v985_v15 = vpop.xlane.xlu0 %984 }
 0x51d   : > { %v1070_v19 = vmul.f32 %v3164_v49, %v1050_v10  ;;  %2262 = vrsqrt.f32 %v1025_v36  ;;  %v1011_v43 = vmul.f32 0.015625, %v985_v15 }
 0x51e   : > { %v2257_v32 = vpop.eup %2256 }
 0x51f   : > { %v1090_v35 = vadd.f32 %v3176_v9, %v1070_v19  ;;  %v1051_v53 = vmul.f32 %v2257_v32, %v3074_v30  ;;  %v1027_v29 = vadd.f32 1e-06, %v1011_v43 }
 0x520   : > { %v991_v7 = vpop.xlane.xlu0 %990 }
 0x521   : > { %v1106_v25 = vmul.f32 0.25, %v1090_v35  ;;  %v1071_v34 = vmul.f32 %v3164_v49, %v1051_v53  ;;  %2264 = vrsqrt.f32 %v1027_v29  ;;  %v1013_v57 = vmul.f32 0.015625, %v991_v7 }
 0x522   : > { %v2259_v0 = vpop.eup %2258 }
 0x523   : > { %v2065_v37 = vpack.c.bf16 %v1106_v25, %v1106_v25  ;;  %v1091_v20 = vadd.f32 %v3176_v9, %v1071_v34  ;;  %v1053_v50 = vmul.f32 %v2259_v0, %v3080_v22  ;;  %v1029_v58 = vadd.f32 1e-06, %v1013_v57 }
 0x524   : > { %v997_v23 = vpop.xlane.xlu0 %996 }
 0x525   : > { %1571 = vst.msk [vmem:[%s3197_s12 + $0x4] sm:$0xf] %vm1569_vm1, %v2065_v37  ;;  %v1107_v6 = vmul.f32 0.25, %v1091_v20  ;;  %v1073_v30 = vmul.f32 %v3164_v49, %v1053_v50  ;;  %2266 = vrsqrt.f32 %v1029_v58  ;;  %v1015_v14 = vmul.f32 0.015625, %v997_v23 }
 0x526   : > { %v2261_v17 = vpop.eup %2260 }
 0x527   : > { %v2066_v5 = vpack.c.bf16 %v1107_v6, %v1107_v6  ;;  %v1093_v27 = vadd.f32 %v3176_v9, %v1073_v30  ;;  %v1055_v11 = vmul.f32 %v2261_v17, %v3088_v63  ;;  %v1031_v47 = vadd.f32 1e-06, %v1015_v14 }
 0x529   : > { %1572 = vst.msk [vmem:[%s3197_s12 + $0x8] sm:$0xf] %vm1569_vm1, %v2066_v5  ;;  %v1109_v22 = vmul.f32 0.25, %v1093_v27  ;;  %v1075_v42 = vmul.f32 %v3164_v49, %v1055_v11  ;;  %2268 = vrsqrt.f32 %v1031_v47 }
 0x52a   : > { %v2263_v48 = vpop.eup %2262 }
 0x52b   : > { %v2068_v16 = vpack.c.bf16 %v1109_v22, %v1109_v22  ;;  %v1095_v31 = vadd.f32 %v3176_v9, %v1075_v42  ;;  %v1057_v55 = vmul.f32 %v2263_v48, %v3094_v4 }
 0x52d   : > { %1574 = vst.msk [vmem:[%s3197_s12 + $0x10] sm:$0xf] %vm1569_vm1, %v2068_v16  ;;  %v1111_v40 = vmul.f32 0.25, %v1095_v31  ;;  %v1077_v63 = vmul.f32 %v3164_v49, %v1057_v55 }
 0x52e   : > { %v2265_v45 = vpop.eup %2264 }
 0x52f   : > { %v2070_v60 = vpack.c.bf16 %v1111_v40, %v1111_v40  ;;  %v1097_v46 = vadd.f32 %v3176_v9, %v1077_v63  ;;  %v1059_v54 = vmul.f32 %v2265_v45, %v3101_v26 }
 0x531   : > { %1576 = vst.msk [vmem:[%s3197_s12 + $0x18] sm:$0xf] %vm1569_vm1, %v2070_v60  ;;  %v1113_v3 = vmul.f32 0.25, %v1097_v46  ;;  %v1079_v38 = vmul.f32 %v3164_v49, %v1059_v54 }
 0x532   : > { %v2267_v2 = vpop.eup %2266 }
 0x533   : > { %v2072_v4 = vpack.c.bf16 %v1113_v3, %v1113_v3  ;;  %v1099_v28 = vadd.f32 %v3176_v9, %v1079_v38  ;;  %v1061_v52 = vmul.f32 %v2267_v2, %v3108_v41 }
 0x535   : > { %1578 = vst.msk [vmem:[%s3197_s12 + $0x20] sm:$0xf] %vm1569_vm1, %v2072_v4  ;;  %v1115_v18 = vmul.f32 0.25, %v1099_v28  ;;  %v1081_v8 = vmul.f32 %v3164_v49, %v1061_v52 }
 0x536   : > { %v2269_v26 = vpop.eup %2268 }
 0x537   : > { %v2074_v56 = vpack.c.bf16 %v1115_v18, %v1115_v18  ;;  %v1101_v61 = vadd.f32 %v3176_v9, %v1081_v8  ;;  %v1063_v13 = vmul.f32 %v2269_v26, %v3115_v62 }
 0x539   : > { %1580 = vst.msk [vmem:[%s3197_s12 + $0x28] sm:$0xf] %vm1569_vm1, %v2074_v56  ;;  %v1117_v51 = vmul.f32 0.25, %v1101_v61  ;;  %v1083_v44 = vmul.f32 %v3164_v49, %v1063_v13 }
 0x53b   : > { %v2076_v59 = vpack.c.bf16 %v1117_v51, %v1117_v51  ;;  %v1103_v41 = vadd.f32 %v3176_v9, %v1083_v44 }
 0x53d   : > { %1582 = vst.msk [vmem:[%s3197_s12 + $0x30] sm:$0xf] %vm1569_vm1, %v2076_v59  ;;  %v1119_v1 = vmul.f32 0.25, %v1103_v41 }
 0x53f   : > { %v2078_v24 = vpack.c.bf16 %v1119_v1, %v1119_v1 }
 0x541   : > { %1584 = vst.msk [vmem:[%s3197_s12 + $0x38] sm:$0xf] %vm1569_vm1, %v2078_v24 }
 0x550   : > { %v1637_v62 = vpop.permute.xlu1 %1636  ;;  %v1635_v49 = vpop.permute.xlu0 %1634 }
 0x551   : > { %1683 = vst.msk [vmem:[%s3290_s15 + $0x4] sm:$0xf] %vm1569_vm1, %v1637_v62  ;;  %1682 = vst.msk [vmem:[%s3290_s15] sm:$0xf] %vm1569_vm1, %v1635_v49 }
 0x554   : > { %v1653_v9 = vpop.permute.xlu1 %1652  ;;  %v1651_v39 = vpop.permute.xlu0 %1650 }
 0x555   : > { %1691 = vst.msk [vmem:[%s3290_s15 + $0x24] sm:$0xf] %vm1569_vm1, %v1653_v9  ;;  %1690 = vst.msk [vmem:[%s3290_s15 + $0x20] sm:$0xf] %vm1569_vm1, %v1651_v39 }
 0x558   : > { %v1639_v33 = vpop.permute.xlu1 %1638  ;;  %v1655_v12 = vpop.permute.xlu0 %1654 }
 0x559   : > { %1684 = vst.msk [vmem:[%s3290_s15 + $0x8] sm:$0xf] %vm1569_vm1, %v1639_v33  ;;  %1692 = vst.msk [vmem:[%s3290_s15 + $0x28] sm:$0xf] %vm1569_vm1, %v1655_v12 }
 0x55c   : > { %v1641_v21 = vpop.permute.xlu1 %1640  ;;  %v1643_v10 = vpop.permute.xlu0 %1642 }
 0x55d   : > { %1685 = vst.msk [vmem:[%s3290_s15 + $0xc] sm:$0xf] %vm1569_vm1, %v1641_v21  ;;  %1686 = vst.msk [vmem:[%s3290_s15 + $0x10] sm:$0xf] %vm1569_vm1, %v1643_v10 }
 0x560   : > { %v1657_v36 = vpop.permute.xlu1 %1656  ;;  %v1659_v15 = vpop.permute.xlu0 %1658 }
 0x561   : > { %1693 = vst.msk [vmem:[%s3290_s15 + $0x2c] sm:$0xf] %vm1569_vm1, %v1657_v36  ;;  %1694 = vst.msk [vmem:[%s3290_s15 + $0x30] sm:$0xf] %vm1569_vm1, %v1659_v15 }
 0x564   : > { %v1645_v19 = vpop.permute.xlu1 %1644  ;;  %v1647_v43 = vpop.permute.xlu0 %1646 }
 0x565   : > { %1687 = vst.msk [vmem:[%s3290_s15 + $0x14] sm:$0xf] %vm1569_vm1, %v1645_v19  ;;  %1688 = vst.msk [vmem:[%s3290_s15 + $0x18] sm:$0xf] %vm1569_vm1, %v1647_v43 }
 0x568   : > { %v1661_v32 = vpop.permute.xlu1 %1660  ;;  %v1663_v35 = vpop.permute.xlu0 %1662 }
 0x569   : > { %1695 = vst.msk [vmem:[%s3290_s15 + $0x34] sm:$0xf] %vm1569_vm1, %v1661_v32  ;;  %1696 = vst.msk [vmem:[%s3290_s15 + $0x38] sm:$0xf] %vm1569_vm1, %v1663_v35 }
 0x56c   : > { %v1649_v53 = vpop.permute.xlu1 %1648 }
 0x56d   : > { %1689 = vst.msk [vmem:[%s3290_s15 + $0x1c] sm:$0xf] %vm1569_vm1, %v1649_v53 }
 0x570   : > { %v1665_v29 = vpop.permute.xlu1 %1664 }
 0x571   : > { %1697 = vst.msk [vmem:[%s3290_s15 + $0x3c] sm:$0xf] %vm1569_vm1, %v1665_v29 }
 0x572 PF: > { %s18_s28 = sadd.s32 1, %s2308_s28   ;;  %s3347_s24 = smov %s2300_s26 }
 0x573   : > { %p15_p7 = scmp.ge.s32.totalorder %s18_s28, 6   ;;  %s3348_s25 = smov %s2304_s27 }
 0x574   : > { %s3349_s26 = smov %s3352_s29  ;;  %s3350_s27 = smov %s3356_s30 }
 0x575   :  { %17 = sbr.rel (!%p15_p7) target bundleno = 3 (0x3), region = 97 }

</bundles_post_ra>
